<compile_context>
chip_gen: v7x
topology: tpu7x:2x2x1
jax: 0.10.0
libtpu: 0.0.40
codegen_flags: <defaults>
</compile_context>

<pallas_src>
import math

import numpy as np
import jax
import jax.numpy as jnp
from jax.experimental import pallas as pl
from jax.experimental.pallas import tpu as pltpu

# ------------------------- small synthetic config --------------------------
IMG = 16          # img_size
PATCH = 8         # patch_size
FRAMES = 1        # num_frames
TUB = 1           # tubelet_size
CIN = 4           # in_chans
DIM = 32          # embed_dim (divisible by 16 for sincos pos embed)
DEPTH = 2         # encoder depth
HEADS = 4         # num_heads
MLP_RATIO = 4.0
BATCH = 2

GRID_T = FRAMES // TUB
GRID_H = IMG // PATCH
GRID_W = IMG // PATCH
L = GRID_T * GRID_H * GRID_W          # num_patches
P = CIN * TUB * PATCH * PATCH         # flattened patch dim (conv3d kernel size)
S = L + 1                             # real seq len incl. cls token
SP = ((S + 7) // 8) * 8               # sublane-padded seq len
DH = DIM // HEADS                     # head dim
HIDDEN = int(DIM * MLP_RATIO)
EPS = 1e-5                            # nn.LayerNorm default eps
BSP = BATCH * SP                      # flattened (padded) token count
OUT_LANES = 128                       # lane-dense output width (>= DIM)
NEG = -1e30                           # additive mask value


# ----------------------- sincos positional embedding -----------------------
def get_1d_sincos_pos_embed_from_grid(embed_dim, pos):
    assert embed_dim % 2 == 0
    omega = np.arange(embed_dim // 2, dtype=np.float32)
    omega /= embed_dim / 2.0
    omega = 1.0 / 10000 ** omega
    pos = np.asarray(pos, dtype=np.float32).reshape(-1)
    out = np.einsum('m,d->md', pos, omega)
    return np.concatenate([np.sin(out), np.cos(out)], axis=1)


def get_3d_sincos_pos_embed(embed_dim, grid_size, cls_token=False):
    assert embed_dim % 16 == 0
    t_size, h_size, w_size = grid_size
    w_embed_dim = embed_dim // 16 * 6
    h_embed_dim = embed_dim // 16 * 6
    t_embed_dim = embed_dim // 16 * 4
    w_pos = get_1d_sincos_pos_embed_from_grid(w_embed_dim, np.arange(w_size))
    h_pos = get_1d_sincos_pos_embed_from_grid(h_embed_dim, np.arange(h_size))
    t_pos = get_1d_sincos_pos_embed_from_grid(t_embed_dim, np.arange(t_size))
    w_pos = np.tile(w_pos, (t_size * h_size, 1))
    h_pos = np.tile(np.repeat(h_pos, w_size, axis=0), (t_size, 1))
    t_pos = np.repeat(t_pos, h_size * w_size, axis=0)
    pos = np.concatenate((w_pos, h_pos, t_pos), axis=1)
    if cls_token:
        pos = np.concatenate([np.zeros([1, embed_dim]), pos], axis=0)
    return pos.astype(np.float32)


# ------------------------------ kernel body ---------------------------------
def _layernorm(x, w, b):
    mu = jnp.mean(x, axis=-1, keepdims=True)
    var = jnp.mean((x - mu) ** 2, axis=-1, keepdims=True)
    return (x - mu) * jax.lax.rsqrt(var + EPS) * w + b


def encoder_kernel(patches_ref, pw_ref, addsl_ref, bias_ref,
                   ln1w_ref, ln1b_ref, qkvw_ref, qkvb_ref, aw_ref, ab_ref,
                   ln2w_ref, ln2b_ref, f1w_ref, f1b_ref, f2w_ref, f2b_ref,
                   nw_ref, nb_ref,
                   out_ref, x_scr):
    d = pl.program_id(0)

    # ---- patch embedding + pos embed + cls row, only on the first layer ----
    # patches_padded rows for the cls/pad slots are zero; the cls token,
    # patch-embed bias and positional embedding are folded into `addsl`
    # host-side, so init is a single full-slab matmul + add (no row scatter).
    @pl.when(d == 0)
    def _init():
        proj = jnp.dot(patches_ref[...].astype(jnp.bfloat16), pw_ref[...],
                       preferred_element_type=jnp.float32)
        x_scr[...] = proj + addsl_ref[...]

    # ---- transformer block `d`: x += Attn(LN1(x)); x += MLP(LN2(x)) ----
    x = x_scr[...]                                          # (BSP, DIM) f32

    h1 = _layernorm(x, ln1w_ref[0], ln1b_ref[0])
    # 1/sqrt(DH) is folded into the Q third of the (bf16) qkv weight & bias.
    qkv = jnp.dot(h1.astype(jnp.bfloat16), qkvw_ref[0],
                  preferred_element_type=jnp.float32) + qkvb_ref[0]   # (BSP, 3*DIM)

    # Head-batched stacks from full-row lane slices (HEADS slices per tensor,
    # no sublane-misaligned per-(batch,head) gathers).
    qh = jnp.stack([qkv[:, h * DH:(h + 1) * DH] for h in range(HEADS)], axis=0)
    kh = jnp.stack([qkv[:, DIM + h * DH:DIM + (h + 1) * DH]
                    for h in range(HEADS)], axis=0)
    vh = jnp.stack([qkv[:, 2 * DIM + h * DH:2 * DIM + (h + 1) * DH]
                    for h in range(HEADS)], axis=0)          # (HEADS, BSP, DH)

    # Packed attention over the flat (B*SP) token axis; the additive bias
    # masks cross-batch pairs and padded key columns (block-diagonal mask).
    # TODO(synk): at production S this dense score tensor must become a
    # KV-tiled online-softmax (flash) loop per batch.
    s = jnp.einsum('hqd,hkd->hqk', qh, kh,
                   preferred_element_type=jnp.float32)       # (HEADS, BSP, BSP)
    s = s + bias_ref[...]
    s = s - jnp.max(s, axis=-1, keepdims=True)
    e = jnp.exp(s)
    a = e / jnp.sum(e, axis=-1, keepdims=True)               # exact softmax
    o = jnp.einsum('hqk,hkd->hqd', a, vh,
                   preferred_element_type=jnp.float32)       # (HEADS, BSP, DH)

    attn = jnp.concatenate([o[h] for h in range(HEADS)], axis=-1)   # (BSP, DIM)
    attn = jnp.dot(attn.astype(jnp.bfloat16), aw_ref[0],
                   preferred_element_type=jnp.float32) + ab_ref[0]
    x = x + attn

    h2 = _layernorm(x, ln2w_ref[0], ln2b_ref[0])
    m = jnp.dot(h2.astype(jnp.bfloat16), f1w_ref[0],
                preferred_element_type=jnp.float32) + f1b_ref[0]
    m = 0.5 * m * (1.0 + jax.lax.erf(m * (1.0 / math.sqrt(2.0))))   # exact GELU
    m = jnp.dot(m.astype(jnp.bfloat16), f2w_ref[0],
                preferred_element_type=jnp.float32) + f2b_ref[0]
    x = x + m

    x_scr[...] = x                                          # carry to next layer

    # ---- final LayerNorm; write one lane-dense (BSP, 128) slab ----
    @pl.when(d == pl.num_programs(0) - 1)
    def _final():
        xn = _layernorm(x, nw_ref[...], nb_ref[...])
        out_ref[...] = jnp.concatenate(
            [xn, jnp.zeros((BSP, OUT_LANES - DIM), jnp.float32)], axis=-1)


# ------------------------------ pallas wrapper ------------------------------
def encoder_call(patches_padded, p):
    def const(shape):
        # whole-array block, fetched once (index does not depend on layer d)
        return pl.BlockSpec(tuple(shape), lambda d, _n=len(shape): (0,) * _n)

    def per_layer(arr):
        # per-layer weight slice, pipelined along the layer grid axis
        return pl.BlockSpec((1,) + tuple(arr.shape[1:]), lambda d: (d, 0, 0))

    layer_names = ('ln1w', 'ln1b', 'qkvw', 'qkvb', 'aw', 'ab',
                   'ln2w', 'ln2b', 'f1w', 'f1b', 'f2w', 'f2b')

    in_specs = ([const(patches_padded.shape), const(p['pw'].shape),
                 const(p['addsl'].shape), const(p['bias'].shape)]
                + [per_layer(p[n]) for n in layer_names]
                + [const(p['nw'].shape), const(p['nb'].shape)])
    operands = ([patches_padded, p['pw'], p['addsl'], p['bias']]
                + [p[n] for n in layer_names]
                + [p['nw'], p['nb']])

    return pl.pallas_call(
        encoder_kernel,
        out_shape=jax.ShapeDtypeStruct((BSP, OUT_LANES), jnp.float32),
        grid=(DEPTH,),
        in_specs=in_specs,
        out_specs=pl.BlockSpec((BSP, OUT_LANES), lambda d: (0, 0)),
        scratch_shapes=[pltpu.VMEM((BSP, DIM), jnp.float32)],
        compiler_params=pltpu.CompilerParams(
            dimension_semantics=("arbitrary",)),   # layer axis carries x_scr
    )(*operands)


# -------------------------- parameter construction --------------------------
def xavier_uniform(key, shape):
    fan_out, fan_in = shape[0], int(np.prod(shape[1:]))
    limit = math.sqrt(6.0 / (fan_in + fan_out))
    return jax.random.uniform(key, shape, jnp.float32, -limit, limit)


def make_params(key):
    """Parameters in kernel-friendly layout: linear weights pre-transposed to
    (in, out) and stored bf16, per-layer tensors stacked on a leading DEPTH
    axis, attention scale folded into the Q third of the QKV weight/bias, and
    cls-token / pos-embed / patch-embed-bias folded into one additive slab."""
    keys = jax.random.split(key, 1 + DEPTH * 4)
    k = 0
    # Conv3d weight (DIM, CIN, TUB, PATCH, PATCH) flattened (DIM, P), stored (P, DIM).
    pw = xavier_uniform(keys[k], (DIM, P)).T; k += 1
    pb = jnp.zeros((DIM,), jnp.float32)

    scale = DH ** -0.5
    # Scale applies to the Q third of both weight columns and bias.
    qscale = jnp.concatenate([jnp.full((DIM,), scale, jnp.float32),
                              jnp.ones((2 * DIM,), jnp.float32)])[None, :]

    names = ('ln1w', 'ln1b', 'qkvw', 'qkvb', 'aw', 'ab',
             'ln2w', 'ln2b', 'f1w', 'f1b', 'f2w', 'f2b')
    stacks = {n: [] for n in names}
    for _ in range(DEPTH):
        w_qkv = xavier_uniform(keys[k], (3 * DIM, DIM)); k += 1
        w_proj = xavier_uniform(keys[k], (DIM, DIM)); k += 1
        w_fc1 = xavier_uniform(keys[k], (HIDDEN, DIM)); k += 1
        w_fc2 = xavier_uniform(keys[k], (DIM, HIDDEN)); k += 1
        stacks['ln1w'].append(jnp.ones((1, DIM), jnp.float32))
        stacks['ln1b'].append(jnp.zeros((1, DIM), jnp.float32))
        stacks['qkvw'].append((w_qkv.T * qscale).astype(jnp.bfloat16))
        stacks['qkvb'].append(jnp.zeros((1, 3 * DIM), jnp.float32) * qscale)
        stacks['aw'].append(w_proj.T.astype(jnp.bfloat16))
        stacks['ab'].append(jnp.zeros((1, DIM), jnp.float32))
        stacks['ln2w'].append(jnp.ones((1, DIM), jnp.float32))
        stacks['ln2b'].append(jnp.zeros((1, DIM), jnp.float32))
        stacks['f1w'].append(w_fc1.T.astype(jnp.bfloat16))
        stacks['f1b'].append(jnp.zeros((1, HIDDEN), jnp.float32))
        stacks['f2w'].append(w_fc2.T.astype(jnp.bfloat16))
        stacks['f2b'].append(jnp.zeros((1, DIM), jnp.float32))
    params = {n: jnp.stack(v, axis=0) for n, v in stacks.items()}

    params['pw'] = pw.astype(jnp.bfloat16)
    params['nw'] = jnp.ones((1, DIM), jnp.float32)
    params['nb'] = jnp.zeros((1, DIM), jnp.float32)

    cls_token = jnp.zeros((DIM,), jnp.float32)               # torch.zeros in __init__
    pos = jnp.asarray(get_3d_sincos_pos_embed(
        DIM, (GRID_T, GRID_H, GRID_W), cls_token=True))      # (S, DIM)
    addsl = jnp.zeros((SP, DIM), jnp.float32)
    addsl = addsl.at[0, :].set(cls_token + pos[0])           # cls row
    addsl = addsl.at[1:1 + L, :].set(pb[None, :] + pos[1:])  # token rows
    params['addsl'] = jnp.tile(addsl, (BATCH, 1))            # (BSP, DIM)

    # Additive attention mask: same-batch AND non-padded key -> 0, else -1e30.
    tok = np.arange(BSP)
    same_batch = (tok[:, None] // SP) == (tok[None, :] // SP)
    valid_key = (tok[None, :] % SP) < S
    params['bias'] = jnp.asarray(
        np.where(same_batch & valid_key, 0.0, NEG).astype(np.float32))
    return params


# ------------------------------- forward pass --------------------------------
def temporal_vit_encoder(x, params):
    """x: (B, C, T, H, W) float32, NCTHW like the PyTorch module."""
    # Glue: extract non-overlapping (tub, ph, pw) patches ordered exactly like
    # the flattened Conv3d weight (c, dt, dh, dw); pure reshape/transpose.
    xr = x.reshape(BATCH, CIN, GRID_T, TUB, GRID_H, PATCH, GRID_W, PATCH)
    xr = xr.transpose(0, 2, 4, 6, 1, 3, 5, 7)     # (B, T', Hp, Wp, C, tub, ph, pw)
    patches = xr.reshape(BATCH, L, P)
    # Pad to the kernel slab layout: row 0 = cls slot, rows 1..L = patches,
    # rows L+1..SP-1 = padding (all zero -> contribute 0 to the matmul).
    ppad = jnp.zeros((BATCH, SP, P), jnp.float32).at[:, 1:1 + L, :].set(patches)
    ppad = ppad.reshape(BSP, P)

    out2d = encoder_call(ppad, params)            # (BSP, 128) lane-dense slab
    out = out2d[:, :DIM].reshape(BATCH, SP, DIM)[:, :S, :]   # strip pad lanes/rows
    return (out,)


if __name__ == "__main__":
    key = jax.random.PRNGKey(0)
    k_x, k_p = jax.random.split(key)
    x = jax.random.normal(k_x, (BATCH, CIN, FRAMES, IMG, IMG), jnp.float32)
    params = make_params(k_p)

    out = temporal_vit_encoder(x, params)
    out0 = jax.block_until_ready(out[0])
    assert out0.shape == (BATCH, S, DIM), out0.shape
    assert bool(jnp.all(jnp.isfinite(out0)))
    print("KERNEL_OK")
</pallas_src>

<mosaic_0001>
module attributes {stable_mosaic.version = 11 : i64} {
  func.func @encoder_kernel(%arg0: i32, %arg1: memref<16x256xf32, #tpu.memory_space<vmem>>, %arg2: memref<256x32xbf16, #tpu.memory_space<vmem>>, %arg3: memref<16x32xf32, #tpu.memory_space<vmem>>, %arg4: memref<16x16xf32, #tpu.memory_space<vmem>>, %arg5: memref<1x1x32xf32, #tpu.memory_space<vmem>>, %arg6: memref<1x1x32xf32, #tpu.memory_space<vmem>>, %arg7: memref<1x32x96xbf16, #tpu.memory_space<vmem>>, %arg8: memref<1x1x96xf32, #tpu.memory_space<vmem>>, %arg9: memref<1x32x32xbf16, #tpu.memory_space<vmem>>, %arg10: memref<1x1x32xf32, #tpu.memory_space<vmem>>, %arg11: memref<1x1x32xf32, #tpu.memory_space<vmem>>, %arg12: memref<1x1x32xf32, #tpu.memory_space<vmem>>, %arg13: memref<1x32x128xbf16, #tpu.memory_space<vmem>>, %arg14: memref<1x1x128xf32, #tpu.memory_space<vmem>>, %arg15: memref<1x128x32xbf16, #tpu.memory_space<vmem>>, %arg16: memref<1x1x32xf32, #tpu.memory_space<vmem>>, %arg17: memref<1x32xf32, #tpu.memory_space<vmem>>, %arg18: memref<1x32xf32, #tpu.memory_space<vmem>>, %arg19: memref<16x128xf32, #tpu.memory_space<vmem>>, %arg20: memref<16x32xf32, #tpu.memory_space<vmem>>) attributes {dimension_semantics = [#tpu.dimension_semantics<arbitrary>], iteration_bounds = array<i64: 2>, scalar_prefetch = 0 : i64, scratch_operands = 1 : i64, tpu.core_type = #tpu.core_type<tc>, window_params = [{pipeline_mode = #tpu.pipeline_mode<synchronous>, transform_indices = @transform_0, window_bounds = array<i64: 16, 256>}, {pipeline_mode = #tpu.pipeline_mode<synchronous>, transform_indices = @transform_1, window_bounds = array<i64: 256, 32>}, {pipeline_mode = #tpu.pipeline_mode<synchronous>, transform_indices = @transform_2, window_bounds = array<i64: 16, 32>}, {pipeline_mode = #tpu.pipeline_mode<synchronous>, transform_indices = @transform_3, window_bounds = array<i64: 16, 16>}, {transform_indices = @transform_4, window_bounds = array<i64: 1, 1, 32>}, {transform_indices = @transform_5, window_bounds = array<i64: 1, 1, 32>}, {transform_indices = @transform_6, window_bounds = array<i64: 1, 32, 96>}, {transform_indices = @transform_7, window_bounds = array<i64: 1, 1, 96>}, {transform_indices = @transform_8, window_bounds = array<i64: 1, 32, 32>}, {transform_indices = @transform_9, window_bounds = array<i64: 1, 1, 32>}, {transform_indices = @transform_10, window_bounds = array<i64: 1, 1, 32>}, {transform_indices = @transform_11, window_bounds = array<i64: 1, 1, 32>}, {transform_indices = @transform_12, window_bounds = array<i64: 1, 32, 128>}, {transform_indices = @transform_13, window_bounds = array<i64: 1, 1, 128>}, {transform_indices = @transform_14, window_bounds = array<i64: 1, 128, 32>}, {transform_indices = @transform_15, window_bounds = array<i64: 1, 1, 32>}, {pipeline_mode = #tpu.pipeline_mode<synchronous>, transform_indices = @transform_16, window_bounds = array<i64: 1, 32>}, {pipeline_mode = #tpu.pipeline_mode<synchronous>, transform_indices = @transform_17, window_bounds = array<i64: 1, 32>}, {pipeline_mode = #tpu.pipeline_mode<synchronous>, transform_indices = @transform_18, window_bounds = array<i64: 16, 128>}]} {
    %c0_i32 = arith.constant 0 : i32
    %0 = arith.cmpi eq, %arg0, %c0_i32 : i32
    %1 = arith.extui %0 : i1 to i32
    %c0_i32_0 = arith.constant 0 : i32
    %2 = arith.cmpi ne, %1, %c0_i32_0 : i32
    scf.if %2 {
      %c0_63 = arith.constant 0 : index
      %c0_64 = arith.constant 0 : index
      %153 = vector.load %arg1[%c0_63, %c0_64] : memref<16x256xf32, #tpu.memory_space<vmem>>, vector<16x256xf32>
      %154 = arith.truncf %153 : vector<16x256xf32> to vector<16x256xbf16>
      %c0_65 = arith.constant 0 : index
      %c0_66 = arith.constant 0 : index
      %155 = vector.load %arg2[%c0_65, %c0_66] : memref<256x32xbf16, #tpu.memory_space<vmem>>, vector<256x32xbf16>
      %cst_67 = arith.constant dense<0.000000e+00> : vector<16x32xf32>
      %156 = tpu.matmul %154, %155, %cst_67 {dimension_numbers = #tpu.dot_dimension_numbers<[1], [0], [0], [1], [0, 0, 1, 1], [], []>} : vector<16x256xbf16>, vector<256x32xbf16>, vector<16x32xf32> -> vector<16x32xf32>
      %c0_68 = arith.constant 0 : index
      %c0_69 = arith.constant 0 : index
      %157 = vector.load %arg3[%c0_68, %c0_69] : memref<16x32xf32, #tpu.memory_space<vmem>>, vector<16x32xf32>
      %158 = arith.addf %156, %157 : vector<16x32xf32>
      %c0_70 = arith.constant 0 : index
      %c0_71 = arith.constant 0 : index
      %159 = vector.load %arg20[%c0_70, %c0_71] : memref<16x32xf32, #tpu.memory_space<vmem>>, vector<16x32xf32>
      tpu.vector_store %arg20[%c0_70, %c0_71], %158 {strides = array<i32>} : memref<16x32xf32, #tpu.memory_space<vmem>>, vector<16x32xf32>,
    } else {
    }
    %c0 = arith.constant 0 : index
    %c0_1 = arith.constant 0 : index
    %3 = vector.load %arg20[%c0, %c0_1] : memref<16x32xf32, #tpu.memory_space<vmem>>, vector<16x32xf32>
    %c0_2 = arith.constant 0 : index
    %c0_3 = arith.constant 0 : index
    %c0_4 = arith.constant 0 : index
    %4 = vector.load %arg5[%c0_2, %c0_3, %c0_4] : memref<1x1x32xf32, #tpu.memory_space<vmem>>, vector<1x1x32xf32>
    %5 = vector.shape_cast %4 : vector<1x1x32xf32> to vector<1x32xf32>
    %c0_5 = arith.constant 0 : index
    %c0_6 = arith.constant 0 : index
    %c0_7 = arith.constant 0 : index
    %6 = vector.load %arg6[%c0_5, %c0_6, %c0_7] : memref<1x1x32xf32, #tpu.memory_space<vmem>>, vector<1x1x32xf32>
    %7 = vector.shape_cast %6 : vector<1x1x32xf32> to vector<1x32xf32>
    %cst = arith.constant dense<0.000000e+00> : vector<16xf32>
    %8 = vector.multi_reduction <add>, %3, %cst [1] : vector<16x32xf32> to vector<16xf32>
    %9 = vector.shape_cast %8 : vector<16xf32> to vector<16x1xf32>
    %cst_8 = arith.constant 3.200000e+01 : f32
    %10 = vector.broadcast %cst_8 : f32 to vector<16x1xf32>
    %11 = arith.divf %9, %10 : vector<16x1xf32>
    %12 = vector.broadcast %11 : vector<16x1xf32> to vector<16x32xf32>
    %13 = arith.subf %3, %12 : vector<16x32xf32>
    %14 = arith.mulf %13, %13 : vector<16x32xf32>
    %cst_9 = arith.constant dense<0.000000e+00> : vector<16xf32>
    %15 = vector.multi_reduction <add>, %14, %cst_9 [1] : vector<16x32xf32> to vector<16xf32>
    %16 = vector.shape_cast %15 : vector<16xf32> to vector<16x1xf32>
    %cst_10 = arith.constant 3.200000e+01 : f32
    %17 = vector.broadcast %cst_10 : f32 to vector<16x1xf32>
    %18 = arith.divf %16, %17 : vector<16x1xf32>
    %19 = vector.broadcast %11 : vector<16x1xf32> to vector<16x32xf32>
    %20 = arith.subf %3, %19 : vector<16x32xf32>
    %cst_11 = arith.constant 9.99999974E-6 : f32
    %21 = vector.broadcast %cst_11 : f32 to vector<16x1xf32>
    %22 = arith.addf %18, %21 : vector<16x1xf32>
    %23 = math.rsqrt %22 : vector<16x1xf32>
    %24 = vector.broadcast %23 : vector<16x1xf32> to vector<16x32xf32>
    %25 = arith.mulf %20, %24 : vector<16x32xf32>
    %26 = vector.broadcast %5 : vector<1x32xf32> to vector<16x32xf32>
    %27 = arith.mulf %25, %26 : vector<16x32xf32>
    %28 = vector.broadcast %7 : vector<1x32xf32> to vector<16x32xf32>
    %29 = arith.addf %27, %28 : vector<16x32xf32>
    %30 = arith.truncf %29 : vector<16x32xf32> to vector<16x32xbf16>
    %c0_12 = arith.constant 0 : index
    %c0_13 = arith.constant 0 : index
    %c0_14 = arith.constant 0 : index
    %31 = vector.load %arg7[%c0_12, %c0_13, %c0_14] : memref<1x32x96xbf16, #tpu.memory_space<vmem>>, vector<1x32x96xbf16>
    %32 = vector.shape_cast %31 : vector<1x32x96xbf16> to vector<32x96xbf16>
    %cst_15 = arith.constant dense<0.000000e+00> : vector<16x96xf32>
    %33 = tpu.matmul %30, %32, %cst_15 {dimension_numbers = #tpu.dot_dimension_numbers<[1], [0], [0], [1], [0, 0, 1, 1], [], []>} : vector<16x32xbf16>, vector<32x96xbf16>, vector<16x96xf32> -> vector<16x96xf32>
    %c0_16 = arith.constant 0 : index
    %c0_17 = arith.constant 0 : index
    %c0_18 = arith.constant 0 : index
    %34 = vector.load %arg8[%c0_16, %c0_17, %c0_18] : memref<1x1x96xf32, #tpu.memory_space<vmem>>, vector<1x1x96xf32>
    %35 = vector.shape_cast %34 : vector<1x1x96xf32> to vector<1x96xf32>
    %36 = vector.broadcast %35 : vector<1x96xf32> to vector<16x96xf32>
    %37 = arith.addf %33, %36 : vector<16x96xf32>
    %38 = vector.extract_strided_slice %37 {offsets = [0, 0], sizes = [16, 8], strides = [1, 1]} : vector<16x96xf32> to vector<16x8xf32>
    %39 = vector.extract_strided_slice %37 {offsets = [0, 8], sizes = [16, 8], strides = [1, 1]} : vector<16x96xf32> to vector<16x8xf32>
    %40 = vector.extract_strided_slice %37 {offsets = [0, 16], sizes = [16, 8], strides = [1, 1]} : vector<16x96xf32> to vector<16x8xf32>
    %41 = vector.extract_strided_slice %37 {offsets = [0, 24], sizes = [16, 8], strides = [1, 1]} : vector<16x96xf32> to vector<16x8xf32>
    %42 = vector.shape_cast %38 : vector<16x8xf32> to vector<1x16x8xf32>
    %43 = vector.shape_cast %39 : vector<16x8xf32> to vector<1x16x8xf32>
    %44 = vector.shape_cast %40 : vector<16x8xf32> to vector<1x16x8xf32>
    %45 = vector.shape_cast %41 : vector<16x8xf32> to vector<1x16x8xf32>
    %46 = tpu.concatenate %42, %43, %44, %45 in 0 : vector<1x16x8xf32>, vector<1x16x8xf32>, vector<1x16x8xf32>, vector<1x16x8xf32> -> vector<4x16x8xf32>
    %47 = vector.extract_strided_slice %37 {offsets = [0, 32], sizes = [16, 8], strides = [1, 1]} : vector<16x96xf32> to vector<16x8xf32>
    %48 = vector.extract_strided_slice %37 {offsets = [0, 40], sizes = [16, 8], strides = [1, 1]} : vector<16x96xf32> to vector<16x8xf32>
    %49 = vector.extract_strided_slice %37 {offsets = [0, 48], sizes = [16, 8], strides = [1, 1]} : vector<16x96xf32> to vector<16x8xf32>
    %50 = vector.extract_strided_slice %37 {offsets = [0, 56], sizes = [16, 8], strides = [1, 1]} : vector<16x96xf32> to vector<16x8xf32>
    %51 = vector.shape_cast %47 : vector<16x8xf32> to vector<1x16x8xf32>
    %52 = vector.shape_cast %48 : vector<16x8xf32> to vector<1x16x8xf32>
    %53 = vector.shape_cast %49 : vector<16x8xf32> to vector<1x16x8xf32>
    %54 = vector.shape_cast %50 : vector<16x8xf32> to vector<1x16x8xf32>
    %55 = tpu.concatenate %51, %52, %53, %54 in 0 : vector<1x16x8xf32>, vector<1x16x8xf32>, vector<1x16x8xf32>, vector<1x16x8xf32> -> vector<4x16x8xf32>
    %56 = vector.extract_strided_slice %37 {offsets = [0, 64], sizes = [16, 8], strides = [1, 1]} : vector<16x96xf32> to vector<16x8xf32>
    %57 = vector.extract_strided_slice %37 {offsets = [0, 72], sizes = [16, 8], strides = [1, 1]} : vector<16x96xf32> to vector<16x8xf32>
    %58 = vector.extract_strided_slice %37 {offsets = [0, 80], sizes = [16, 8], strides = [1, 1]} : vector<16x96xf32> to vector<16x8xf32>
    %59 = vector.extract_strided_slice %37 {offsets = [0, 88], sizes = [16, 8], strides = [1, 1]} : vector<16x96xf32> to vector<16x8xf32>
    %60 = vector.shape_cast %56 : vector<16x8xf32> to vector<1x16x8xf32>
    %61 = vector.shape_cast %57 : vector<16x8xf32> to vector<1x16x8xf32>
    %62 = vector.shape_cast %58 : vector<16x8xf32> to vector<1x16x8xf32>
    %63 = vector.shape_cast %59 : vector<16x8xf32> to vector<1x16x8xf32>
    %64 = tpu.concatenate %60, %61, %62, %63 in 0 : vector<1x16x8xf32>, vector<1x16x8xf32>, vector<1x16x8xf32>, vector<1x16x8xf32> -> vector<4x16x8xf32>
    "tpu.trace_start"() <{level = 10 : i32, message = "hqd,hkd->hqk"}> : () -> ()
    %cst_19 = arith.constant dense<0.000000e+00> : vector<4x16x16xf32>
    %65 = tpu.matmul %46, %55, %cst_19 {dimension_numbers = #tpu.dot_dimension_numbers<[2], [2], [1], [1], [0, 0, 0, 1, 1, 1], [0], [0]>} : vector<4x16x8xf32>, vector<4x16x8xf32>, vector<4x16x16xf32> -> vector<4x16x16xf32>
    "tpu.trace_stop"() : () -> ()
    %c0_20 = arith.constant 0 : index
    %c0_21 = arith.constant 0 : index
    %66 = vector.load %arg4[%c0_20, %c0_21] : memref<16x16xf32, #tpu.memory_space<vmem>>, vector<16x16xf32>
    %67 = vector.shape_cast %66 : vector<16x16xf32> to vector<1x16x16xf32>
    %68 = vector.broadcast %67 : vector<1x16x16xf32> to vector<4x16x16xf32>
    %69 = arith.addf %65, %68 : vector<4x16x16xf32>
    %cst_22 = arith.constant dense<0xFF800000> : vector<4x16xf32>
    %70 = vector.multi_reduction <maximumf>, %69, %cst_22 [2] : vector<4x16x16xf32> to vector<4x16xf32>
    %71 = vector.shape_cast %70 : vector<4x16xf32> to vector<4x16x1xf32>
    %72 = vector.broadcast %71 : vector<4x16x1xf32> to vector<4x16x16xf32>
    %73 = arith.subf %69, %72 : vector<4x16x16xf32>
    %74 = math.exp %73 : vector<4x16x16xf32>
    %cst_23 = arith.constant dense<0.000000e+00> : vector<4x16xf32>
    %75 = vector.multi_reduction <add>, %74, %cst_23 [2] : vector<4x16x16xf32> to vector<4x16xf32>
    %76 = vector.shape_cast %75 : vector<4x16xf32> to vector<4x16x1xf32>
    %77 = vector.broadcast %76 : vector<4x16x1xf32> to vector<4x16x16xf32>
    %78 = arith.divf %74, %77 : vector<4x16x16xf32>
    "tpu.trace_start"() <{level = 10 : i32, message = "hqk,hkd->hqd"}> : () -> ()
    %cst_24 = arith.constant dense<0.000000e+00> : vector<4x16x8xf32>
    %79 = tpu.matmul %78, %64, %cst_24 {dimension_numbers = #tpu.dot_dimension_numbers<[2], [1], [1], [2], [0, 0, 0, 1, 1, 2], [0], [0]>} : vector<4x16x16xf32>, vector<4x16x8xf32>, vector<4x16x8xf32> -> vector<4x16x8xf32>
    "tpu.trace_stop"() : () -> ()
    %80 = vector.extract_strided_slice %79 {offsets = [0, 0, 0], sizes = [1, 16, 8], strides = [1, 1, 1]} : vector<4x16x8xf32> to vector<1x16x8xf32>
    %81 = vector.shape_cast %80 : vector<1x16x8xf32> to vector<16x8xf32>
    %82 = vector.extract_strided_slice %79 {offsets = [1, 0, 0], sizes = [1, 16, 8], strides = [1, 1, 1]} : vector<4x16x8xf32> to vector<1x16x8xf32>
    %83 = vector.shape_cast %82 : vector<1x16x8xf32> to vector<16x8xf32>
    %84 = vector.extract_strided_slice %79 {offsets = [2, 0, 0], sizes = [1, 16, 8], strides = [1, 1, 1]} : vector<4x16x8xf32> to vector<1x16x8xf32>
    %85 = vector.shape_cast %84 : vector<1x16x8xf32> to vector<16x8xf32>
    %86 = vector.extract_strided_slice %79 {offsets = [3, 0, 0], sizes = [1, 16, 8], strides = [1, 1, 1]} : vector<4x16x8xf32> to vector<1x16x8xf32>
    %87 = vector.shape_cast %86 : vector<1x16x8xf32> to vector<16x8xf32>
    %88 = tpu.concatenate %81, %83, %85, %87 in 1 : vector<16x8xf32>, vector<16x8xf32>, vector<16x8xf32>, vector<16x8xf32> -> vector<16x32xf32>
    %89 = arith.truncf %88 : vector<16x32xf32> to vector<16x32xbf16>
    %c0_25 = arith.constant 0 : index
    %c0_26 = arith.constant 0 : index
    %c0_27 = arith.constant 0 : index
    %90 = vector.load %arg9[%c0_25, %c0_26, %c0_27] : memref<1x32x32xbf16, #tpu.memory_space<vmem>>, vector<1x32x32xbf16>
    %91 = vector.shape_cast %90 : vector<1x32x32xbf16> to vector<32x32xbf16>
    %cst_28 = arith.constant dense<0.000000e+00> : vector<16x32xf32>
    %92 = tpu.matmul %89, %91, %cst_28 {dimension_numbers = #tpu.dot_dimension_numbers<[1], [0], [0], [1], [0, 0, 1, 1], [], []>} : vector<16x32xbf16>, vector<32x32xbf16>, vector<16x32xf32> -> vector<16x32xf32>
    %c0_29 = arith.constant 0 : index
    %c0_30 = arith.constant 0 : index
    %c0_31 = arith.constant 0 : index
    %93 = vector.load %arg10[%c0_29, %c0_30, %c0_31] : memref<1x1x32xf32, #tpu.memory_space<vmem>>, vector<1x1x32xf32>
    %94 = vector.shape_cast %93 : vector<1x1x32xf32> to vector<1x32xf32>
    %95 = vector.broadcast %94 : vector<1x32xf32> to vector<16x32xf32>
    %96 = arith.addf %92, %95 : vector<16x32xf32>
    %97 = arith.addf %3, %96 : vector<16x32xf32>
    %c0_32 = arith.constant 0 : index
    %c0_33 = arith.constant 0 : index
    %c0_34 = arith.constant 0 : index
    %98 = vector.load %arg11[%c0_32, %c0_33, %c0_34] : memref<1x1x32xf32, #tpu.memory_space<vmem>>, vector<1x1x32xf32>
    %99 = vector.shape_cast %98 : vector<1x1x32xf32> to vector<1x32xf32>
    %c0_35 = arith.constant 0 : index
    %c0_36 = arith.constant 0 : index
    %c0_37 = arith.constant 0 : index
    %100 = vector.load %arg12[%c0_35, %c0_36, %c0_37] : memref<1x1x32xf32, #tpu.memory_space<vmem>>, vector<1x1x32xf32>
    %101 = vector.shape_cast %100 : vector<1x1x32xf32> to vector<1x32xf32>
    %cst_38 = arith.constant dense<0.000000e+00> : vector<16xf32>
    %102 = vector.multi_reduction <add>, %97, %cst_38 [1] : vector<16x32xf32> to vector<16xf32>
    %103 = vector.shape_cast %102 : vector<16xf32> to vector<16x1xf32>
    %cst_39 = arith.constant 3.200000e+01 : f32
    %104 = vector.broadcast %cst_39 : f32 to vector<16x1xf32>
    %105 = arith.divf %103, %104 : vector<16x1xf32>
    %106 = vector.broadcast %105 : vector<16x1xf32> to vector<16x32xf32>
    %107 = arith.subf %97, %106 : vector<16x32xf32>
    %108 = arith.mulf %107, %107 : vector<16x32xf32>
    %cst_40 = arith.constant dense<0.000000e+00> : vector<16xf32>
    %109 = vector.multi_reduction <add>, %108, %cst_40 [1] : vector<16x32xf32> to vector<16xf32>
    %110 = vector.shape_cast %109 : vector<16xf32> to vector<16x1xf32>
    %cst_41 = arith.constant 3.200000e+01 : f32
    %111 = vector.broadcast %cst_41 : f32 to vector<16x1xf32>
    %112 = arith.divf %110, %111 : vector<16x1xf32>
    %113 = vector.broadcast %105 : vector<16x1xf32> to vector<16x32xf32>
    %114 = arith.subf %97, %113 : vector<16x32xf32>
    %cst_42 = arith.constant 9.99999974E-6 : f32
    %115 = vector.broadcast %cst_42 : f32 to vector<16x1xf32>
    %116 = arith.addf %112, %115 : vector<16x1xf32>
    %117 = math.rsqrt %116 : vector<16x1xf32>
    %118 = vector.broadcast %117 : vector<16x1xf32> to vector<16x32xf32>
    %119 = arith.mulf %114, %118 : vector<16x32xf32>
    %120 = vector.broadcast %99 : vector<1x32xf32> to vector<16x32xf32>
    %121 = arith.mulf %119, %120 : vector<16x32xf32>
    %122 = vector.broadcast %101 : vector<1x32xf32> to vector<16x32xf32>
    %123 = arith.addf %121, %122 : vector<16x32xf32>
    %124 = arith.truncf %123 : vector<16x32xf32> to vector<16x32xbf16>
    %c0_43 = arith.constant 0 : index
    %c0_44 = arith.constant 0 : index
    %c0_45 = arith.constant 0 : index
    %125 = vector.load %arg13[%c0_43, %c0_44, %c0_45] : memref<1x32x128xbf16, #tpu.memory_space<vmem>>, vector<1x32x128xbf16>
    %126 = vector.shape_cast %125 : vector<1x32x128xbf16> to vector<32x128xbf16>
    %cst_46 = arith.constant dense<0.000000e+00> : vector<16x128xf32>
    %127 = tpu.matmul %124, %126, %cst_46 {dimension_numbers = #tpu.dot_dimension_numbers<[1], [0], [0], [1], [0, 0, 1, 1], [], []>} : vector<16x32xbf16>, vector<32x128xbf16>, vector<16x128xf32> -> vector<16x128xf32>
    %c0_47 = arith.constant 0 : index
    %c0_48 = arith.constant 0 : index
    %c0_49 = arith.constant 0 : index
    %128 = vector.load %arg14[%c0_47, %c0_48, %c0_49] : memref<1x1x128xf32, #tpu.memory_space<vmem>>, vector<1x1x128xf32>
    %129 = vector.shape_cast %128 : vector<1x1x128xf32> to vector<1x128xf32>
    %130 = vector.broadcast %129 : vector<1x128xf32> to vector<16x128xf32>
    %131 = arith.addf %127, %130 : vector<16x128xf32>
    %cst_50 = arith.constant 5.000000e-01 : f32
    %132 = vector.broadcast %cst_50 : f32 to vector<16x128xf32>
    %133 = arith.mulf %132, %131 : vector<16x128xf32>
    %cst_51 = arith.constant 0.707106769 : f32
    %134 = vector.broadcast %cst_51 : f32 to vector<16x128xf32>
    %135 = arith.mulf %131, %134 : vector<16x128xf32>
    %136 = math.erf %135 : vector<16x128xf32>
    %cst_52 = arith.constant 1.000000e+00 : f32
    %137 = vector.broadcast %cst_52 : f32 to vector<16x128xf32>
    %138 = arith.addf %137, %136 : vector<16x128xf32>
    %139 = arith.mulf %133, %138 : vector<16x128xf32>
    %140 = arith.truncf %139 : vector<16x128xf32> to vector<16x128xbf16>
    %c0_53 = arith.constant 0 : index
    %c0_54 = arith.constant 0 : index
    %c0_55 = arith.constant 0 : index
    %141 = vector.load %arg15[%c0_53, %c0_54, %c0_55] : memref<1x128x32xbf16, #tpu.memory_space<vmem>>, vector<1x128x32xbf16>
    %142 = vector.shape_cast %141 : vector<1x128x32xbf16> to vector<128x32xbf16>
    %cst_56 = arith.constant dense<0.000000e+00> : vector<16x32xf32>
    %143 = tpu.matmul %140, %142, %cst_56 {dimension_numbers = #tpu.dot_dimension_numbers<[1], [0], [0], [1], [0, 0, 1, 1], [], []>} : vector<16x128xbf16>, vector<128x32xbf16>, vector<16x32xf32> -> vector<16x32xf32>
    %c0_57 = arith.constant 0 : index
    %c0_58 = arith.constant 0 : index
    %c0_59 = arith.constant 0 : index
    %144 = vector.load %arg16[%c0_57, %c0_58, %c0_59] : memref<1x1x32xf32, #tpu.memory_space<vmem>>, vector<1x1x32xf32>
    %145 = vector.shape_cast %144 : vector<1x1x32xf32> to vector<1x32xf32>
    %146 = vector.broadcast %145 : vector<1x32xf32> to vector<16x32xf32>
    %147 = arith.addf %143, %146 : vector<16x32xf32>
    %148 = arith.addf %97, %147 : vector<16x32xf32>
    %c0_60 = arith.constant 0 : index
    %c0_61 = arith.constant 0 : index
    %149 = vector.load %arg20[%c0_60, %c0_61] : memref<16x32xf32, #tpu.memory_space<vmem>>, vector<16x32xf32>
    tpu.vector_store %arg20[%c0_60, %c0_61], %148 {strides = array<i32>} : memref<16x32xf32, #tpu.memory_space<vmem>>, vector<16x32xf32>,
    %c1_i32 = arith.constant 1 : i32
    %150 = arith.cmpi eq, %arg0, %c1_i32 : i32
    %151 = arith.extui %150 : i1 to i32
    %c0_i32_62 = arith.constant 0 : i32
    %152 = arith.cmpi ne, %151, %c0_i32_62 : i32
    scf.if %152 {
      %c0_63 = arith.constant 0 : index
      %c0_64 = arith.constant 0 : index
      %153 = vector.load %arg17[%c0_63, %c0_64] : memref<1x32xf32, #tpu.memory_space<vmem>>, vector<1x32xf32>
      %c0_65 = arith.constant 0 : index
      %c0_66 = arith.constant 0 : index
      %154 = vector.load %arg18[%c0_65, %c0_66] : memref<1x32xf32, #tpu.memory_space<vmem>>, vector<1x32xf32>
      %cst_67 = arith.constant dense<0.000000e+00> : vector<16xf32>
      %155 = vector.multi_reduction <add>, %148, %cst_67 [1] : vector<16x32xf32> to vector<16xf32>
      %156 = vector.shape_cast %155 : vector<16xf32> to vector<16x1xf32>
      %cst_68 = arith.constant 3.200000e+01 : f32
      %157 = vector.broadcast %cst_68 : f32 to vector<16x1xf32>
      %158 = arith.divf %156, %157 : vector<16x1xf32>
      %159 = vector.broadcast %158 : vector<16x1xf32> to vector<16x32xf32>
      %160 = arith.subf %148, %159 : vector<16x32xf32>
      %161 = arith.mulf %160, %160 : vector<16x32xf32>
      %cst_69 = arith.constant dense<0.000000e+00> : vector<16xf32>
      %162 = vector.multi_reduction <add>, %161, %cst_69 [1] : vector<16x32xf32> to vector<16xf32>
      %163 = vector.shape_cast %162 : vector<16xf32> to vector<16x1xf32>
      %cst_70 = arith.constant 3.200000e+01 : f32
      %164 = vector.broadcast %cst_70 : f32 to vector<16x1xf32>
      %165 = arith.divf %163, %164 : vector<16x1xf32>
      %166 = vector.broadcast %158 : vector<16x1xf32> to vector<16x32xf32>
      %167 = arith.subf %148, %166 : vector<16x32xf32>
      %cst_71 = arith.constant 9.99999974E-6 : f32
      %168 = vector.broadcast %cst_71 : f32 to vector<16x1xf32>
      %169 = arith.addf %165, %168 : vector<16x1xf32>
      %170 = math.rsqrt %169 : vector<16x1xf32>
      %171 = vector.broadcast %170 : vector<16x1xf32> to vector<16x32xf32>
      %172 = arith.mulf %167, %171 : vector<16x32xf32>
      %173 = vector.broadcast %153 : vector<1x32xf32> to vector<16x32xf32>
      %174 = arith.mulf %172, %173 : vector<16x32xf32>
      %175 = vector.broadcast %154 : vector<1x32xf32> to vector<16x32xf32>
      %176 = arith.addf %174, %175 : vector<16x32xf32>
      %cst_72 = arith.constant 0.000000e+00 : f32
      %177 = vector.broadcast %cst_72 : f32 to vector<16x96xf32>
      %178 = tpu.concatenate %176, %177 in 1 : vector<16x32xf32>, vector<16x96xf32> -> vector<16x128xf32>
      %c0_73 = arith.constant 0 : index
      %c0_74 = arith.constant 0 : index
      %179 = vector.load %arg19[%c0_73, %c0_74] : memref<16x128xf32, #tpu.memory_space<vmem>>, vector<16x128xf32>
      tpu.vector_store %arg19[%c0_73, %c0_74], %178 {strides = array<i32>} : memref<16x128xf32, #tpu.memory_space<vmem>>, vector<16x128xf32>,
    } else {
    }
    return
  }
  func.func @transform_0(%arg0: i32) -> (i32, i32) {
    %c0_i32 = arith.constant 0 : i32
    %c0_i32_0 = arith.constant 0 : i32
    %c0_i32_1 = arith.constant 0 : i32
    return %c0_i32, %c0_i32_0 : i32, i32
  }
  func.func @transform_1(%arg0: i32) -> (i32, i32) {
    %c0_i32 = arith.constant 0 : i32
    %c0_i32_0 = arith.constant 0 : i32
    %c0_i32_1 = arith.constant 0 : i32
    return %c0_i32, %c0_i32_0 : i32, i32
  }
  func.func @transform_2(%arg0: i32) -> (i32, i32) {
    %c0_i32 = arith.constant 0 : i32
    %c0_i32_0 = arith.constant 0 : i32
    %c0_i32_1 = arith.constant 0 : i32
    return %c0_i32, %c0_i32_0 : i32, i32
  }
  func.func @transform_3(%arg0: i32) -> (i32, i32) {
    %c0_i32 = arith.constant 0 : i32
    %c0_i32_0 = arith.constant 0 : i32
    %c0_i32_1 = arith.constant 0 : i32
    return %c0_i32, %c0_i32_0 : i32, i32
  }
  func.func @transform_4(%arg0: i32) -> (i32, i32, i32) {
    %c0_i32 = arith.constant 0 : i32
    %c0_i32_0 = arith.constant 0 : i32
    %c0_i32_1 = arith.constant 0 : i32
    return %arg0, %c0_i32, %c0_i32_0 : i32, i32, i32
  }
  func.func @transform_5(%arg0: i32) -> (i32, i32, i32) {
    %c0_i32 = arith.constant 0 : i32
    %c0_i32_0 = arith.constant 0 : i32
    %c0_i32_1 = arith.constant 0 : i32
    return %arg0, %c0_i32, %c0_i32_0 : i32, i32, i32
  }
  func.func @transform_6(%arg0: i32) -> (i32, i32, i32) {
    %c0_i32 = arith.constant 0 : i32
    %c0_i32_0 = arith.constant 0 : i32
    %c0_i32_1 = arith.constant 0 : i32
    return %arg0, %c0_i32, %c0_i32_0 : i32, i32, i32
  }
  func.func @transform_7(%arg0: i32) -> (i32, i32, i32) {
    %c0_i32 = arith.constant 0 : i32
    %c0_i32_0 = arith.constant 0 : i32
    %c0_i32_1 = arith.constant 0 : i32
    return %arg0, %c0_i32, %c0_i32_0 : i32, i32, i32
  }
  func.func @transform_8(%arg0: i32) -> (i32, i32, i32) {
    %c0_i32 = arith.constant 0 : i32
    %c0_i32_0 = arith.constant 0 : i32
    %c0_i32_1 = arith.constant 0 : i32
    return %arg0, %c0_i32, %c0_i32_0 : i32, i32, i32
  }
  func.func @transform_9(%arg0: i32) -> (i32, i32, i32) {
    %c0_i32 = arith.constant 0 : i32
    %c0_i32_0 = arith.constant 0 : i32
    %c0_i32_1 = arith.constant 0 : i32
    return %arg0, %c0_i32, %c0_i32_0 : i32, i32, i32
  }
  func.func @transform_10(%arg0: i32) -> (i32, i32, i32) {
    %c0_i32 = arith.constant 0 : i32
    %c0_i32_0 = arith.constant 0 : i32
    %c0_i32_1 = arith.constant 0 : i32
    return %arg0, %c0_i32, %c0_i32_0 : i32, i32, i32
  }
  func.func @transform_11(%arg0: i32) -> (i32, i32, i32) {
    %c0_i32 = arith.constant 0 : i32
    %c0_i32_0 = arith.constant 0 : i32
    %c0_i32_1 = arith.constant 0 : i32
    return %arg0, %c0_i32, %c0_i32_0 : i32, i32, i32
  }
  func.func @transform_12(%arg0: i32) -> (i32, i32, i32) {
    %c0_i32 = arith.constant 0 : i32
    %c0_i32_0 = arith.constant 0 : i32
    %c0_i32_1 = arith.constant 0 : i32
    return %arg0, %c0_i32, %c0_i32_0 : i32, i32, i32
  }
  func.func @transform_13(%arg0: i32) -> (i32, i32, i32) {
    %c0_i32 = arith.constant 0 : i32
    %c0_i32_0 = arith.constant 0 : i32
    %c0_i32_1 = arith.constant 0 : i32
    return %arg0, %c0_i32, %c0_i32_0 : i32, i32, i32
  }
  func.func @transform_14(%arg0: i32) -> (i32, i32, i32) {
    %c0_i32 = arith.constant 0 : i32
    %c0_i32_0 = arith.constant 0 : i32
    %c0_i32_1 = arith.constant 0 : i32
    return %arg0, %c0_i32, %c0_i32_0 : i32, i32, i32
  }
  func.func @transform_15(%arg0: i32) -> (i32, i32, i32) {
    %c0_i32 = arith.constant 0 : i32
    %c0_i32_0 = arith.constant 0 : i32
    %c0_i32_1 = arith.constant 0 : i32
    return %arg0, %c0_i32, %c0_i32_0 : i32, i32, i32
  }
  func.func @transform_16(%arg0: i32) -> (i32, i32) {
    %c0_i32 = arith.constant 0 : i32
    %c0_i32_0 = arith.constant 0 : i32
    %c0_i32_1 = arith.constant 0 : i32
    return %c0_i32, %c0_i32_0 : i32, i32
  }
  func.func @transform_17(%arg0: i32) -> (i32, i32) {
    %c0_i32 = arith.constant 0 : i32
    %c0_i32_0 = arith.constant 0 : i32
    %c0_i32_1 = arith.constant 0 : i32
    return %c0_i32, %c0_i32_0 : i32, i32
  }
  func.func @transform_18(%arg0: i32) -> (i32, i32) {
    %c0_i32 = arith.constant 0 : i32
    %c0_i32_0 = arith.constant 0 : i32
    %c0_i32_1 = arith.constant 0 : i32
    return %c0_i32, %c0_i32_0 : i32, i32
  }
}

</mosaic_0001>

<bundles_post_ra>
// kernel: tpu_custom_call.1
= control target key start
LH: loop header
LB: loop body
LE: loop exit
PB: predicated region body
PF: predicated region fallthrough
CT: control target
= control target key end

     0   :  { %s3379_s0 = inlined_call_operand.vmem [shape: f32[16,256], index: 0, kind: input, shape index: {}]   ;;  %s3380_s1 = inlined_call_operand.vmem [shape: bf16[256,32], index: 1, kind: input, shape index: {}]   ;;  %s3381_s2 = inlined_call_operand.vmem [shape: f32[16,32], index: 2, kind: input, shape index: {}]   ;;  %s3382_s3 = inlined_call_operand.vmem [shape: f32[16,16], index: 3, kind: input, shape index: {}]   ;;  %s3383_s4 = inlined_call_operand.vmem [shape: f32[2,1,32], index: 4, kind: input, shape index: {}]   ;;  %s3384_s5 = inlined_call_operand.vmem [shape: f32[2,1,32], index: 5, kind: input, shape index: {}]   ;;  %s3385_s6 = inlined_call_operand.vmem [shape: bf16[2,32,96], index: 6, kind: input, shape index: {}]   ;;  %s3386_s7 = inlined_call_operand.vmem [shape: f32[2,1,96], index: 7, kind: input, shape index: {}]   ;;  %s3387_s8 = inlined_call_operand.vmem [shape: bf16[2,32,32], index: 8, kind: input, shape index: {}]   ;;  %s3388_s9 = inlined_call_operand.vmem [shape: f32[2,1,32], index: 9, kind: input, shape index: {}]   ;;  %s3389_s10 = inlined_call_operand.vmem [shape: f32[2,1,32], index: 10, kind: input, shape index: {}]   ;;  %s3390_s11 = inlined_call_operand.vmem [shape: f32[2,1,32], index: 11, kind: input, shape index: {}]   ;;  %s3391_s12 = inlined_call_operand.vmem [shape: bf16[2,32,128], index: 12, kind: input, shape index: {}]   ;;  %s3392_s13 = inlined_call_operand.vmem [shape: f32[2,1,128], index: 13, kind: input, shape index: {}]   ;;  %s3393_s14 = inlined_call_operand.vmem [shape: bf16[2,128,32], index: 14, kind: input, shape index: {}]   ;;  %s3394_s15 = inlined_call_operand.vmem [shape: f32[2,1,32], index: 15, kind: input, shape index: {}]   ;;  %s3395_s16 = inlined_call_operand.vmem [shape: f32[1,32], index: 16, kind: input, shape index: {}]   ;;  %s3396_s17 = inlined_call_operand.vmem [shape: f32[1,32], index: 17, kind: input, shape index: {}]   ;;  %s3397_s18 = inlined_call_operand.hbm [shape: f32[16,128], index: 18, kind: output, shape index: {}]  }
   0x1   :  { %3404 = sst [smem:[#allocation8_spill]] %s3379_s0 }
   0x2   :  { %3405 = sst [smem:[#allocation9_spill]] %s3380_s1 }
   0x3   :  { %3406 = sst [smem:[#allocation10_spill]] %s3381_s2 }
   0x4   :  { %3407 = sst [smem:[#allocation11_spill]] %s3385_s6 }
   0x5   :  { %3408 = sst [smem:[#allocation12_spill]] %s3387_s8 }
   0x6   :  { %3409 = sst [smem:[#allocation13_spill]] %s3395_s16 }
   0x7   :  { %3410 = sst [smem:[#allocation14_spill]] %s3396_s17 }
   0x8   :  { %3411 = sst [smem:[#allocation15_spill]] %s3397_s18 }
   0x9   :  { %23 = vsyncpa [#allocation4], 0  ;;  %s2990_s27 = smov 0  }
   0xa LB: > { %3412 = sst [smem:[#allocation6_spill]] %s2881_s27  ;;  %s2996_s28 = sadd.s32 4294967295, %s2881_s27   ;;  %s2881_s27 = sphi %s2990_s27, %s29_s27  }
   0xb   : > { %p2388_p0 = scmp.ge.s32.totalorder %s2881_s27, 1  ;;  %p602_p1 = scmp.lt.s32.totalorder %s2881_s27, 3 }
   0xd   : > { %p603_p2 = pnand %p2388_p0, %p602_p1 }
   0xf   : > { %606 = sbr.rel (%p603_p2) target bundleno = 3292 (0xcdc), region = 92 }
  0x16   : > { %p690_p3 = scmp.lt.s32.totalorder %s2996_s28, 1  ;;  %s3413_s6 = sld [smem:[#allocation11_spill]] }
  0x17   : > { %s3414_s8 = sld [smem:[#allocation12_spill]]  ;;  %p2397_p4 = scmp.ne.s32.totalorder %s2996_s28, 0 }
  0x18   : > { %s3002_s29 = scalar_select %p690_p3, %s2996_s28, 1 }
  0x19   : > { %738 = sbr.rel (%p2397_p4) target bundleno = 284 (0x11c), region = 96  ;;  %s3416_s25 = sld [smem:[#allocation9_spill]] (!%p2397_p4)  ;;  %vm916_vm0 = vcmask (!%p2397_p4), 261120  }
  0x1a   : > { %s2470_s22 = sshll.u32 %s3002_s29, 4  ;;  %s714_s16 = scalar_lea.vmem %s3389_s10, %s3002_s29 }
  0x1b   : > { %s717_s24 = scalar_lea.vmem %s3390_s11, %s3002_s29  ;;  %s3417_s2 = sld [smem:[#allocation8_spill]] (!%p2397_p4) }
  0x1c   : > { %s3020_s30 = scalar_lea.vmem %s3413_s6, %s2470_s22  ;;  %s3042_s6 = scalar_lea.vmem %s3391_s12, %s2470_s22 }
  0x1d   : > { %s3025_s18 = scalar_lea.vmem %s3414_s8, %s2470_s22  ;;  %s725_s8 = scalar_lea.vmem %s3392_s13, %s3002_s29 }
  0x1e   : > { %3415 = sst [smem:[#allocation7_spill]] %s3025_s18  ;;  %s2473_s18 = sshll.u32 %s3002_s29, 6 }
  0x1f   : > { %s3052_s1 = scalar_lea.vmem %s3393_s14, %s2473_s18  ;;  %v2712_v0 = vld [vmem:[%s3416_s25 + $0x40] sm:$0xff] (!%p2397_p4)   ;;  %v2714_v2 = vld [vmem:[%s3416_s25 + $0x48] sm:$0xff] (!%p2397_p4)   ;;  %v2716_v4 = vld [vmem:[%s3416_s25 + $0x50] sm:$0xff] (!%p2397_p4)   ;;  %s3418_s26 = sld [smem:[#allocation10_spill]] (!%p2397_p4) }
  0x20   : > { %v2713_v1 = vld [vmem:[%s3416_s25] sm:$0xff]   ;;  %2474 = vmatprep.subr.bf16.mxu0 %v2712_v0  ;;  %v2715_v3 = vld [vmem:[%s3416_s25 + $0x8] sm:$0xff]   ;;  %v2717_v5 = vld [vmem:[%s3416_s25 + $0x10] sm:$0xff]  }
  0x21   : > { %2475 = vmatpush3.bf16.msra.mxu0 %v2713_v1  ;;  %v2718_v6 = vld [vmem:[%s3416_s25 + $0x58] sm:$0xff]   ;;  %v2720_v8 = vld [vmem:[%s3416_s25 + $0x60] sm:$0xff]   ;;  %v2722_v10 = vld [vmem:[%s3416_s25 + $0x68] sm:$0xff]  }
  0x22   : > { %2476 = vmatprep.subr.bf16.mxu0 %v2714_v2  ;;  %v2719_v7 = vld [vmem:[%s3416_s25 + $0x18] sm:$0xff]   ;;  %v2721_v9 = vld [vmem:[%s3416_s25 + $0x20] sm:$0xff]   ;;  %v740_v11 = vld [vmem:[%s3417_s2 + $0x8] sm:$0xff] }
  0x23   : > { %v742_v12 = vld [vmem:[%s3417_s2 + $0x18] sm:$0xff]  ;;  %v2723_v14 = vld [vmem:[%s3416_s25 + $0x28] sm:$0xff]   ;;  %v2724_v15 = vld [vmem:[%s3416_s25 + $0x70] sm:$0xff]  }
  0x24   : > { %v744_v13 = vpack.c.bf16 %v742_v12, %v740_v11  ;;  %v2725_v16 = vld [vmem:[%s3416_s25 + $0x30] sm:$0xff]   ;;  %v2726_v17 = vld [vmem:[%s3416_s25 + $0x78] sm:$0xff]   ;;  %v739_v19 = vld [vmem:[%s3417_s2] sm:$0xff] }
  0x25   : > { %2477 = vmatpush3.bf16.msra.mxu0 %v2715_v3  ;;  %v2727_v18 = vld [vmem:[%s3416_s25 + $0x38] sm:$0xff]   ;;  %v741_v20 = vld [vmem:[%s3417_s2 + $0x10] sm:$0xff]  ;;  %v777_v23 = vld [vmem:[%s3418_s26] sm:$0xff] }
  0x26   : > { %2478 = vmatprep.subr.bf16.mxu0 %v2716_v4  ;;  %907 = vmatprep.mubr.bf16.mxu0 %v744_v13  ;;  %v743_v21 = vpack.c.bf16 %v741_v20, %v739_v19  ;;  %v778_v27 = vld [vmem:[%s3418_s26 + $0x8] sm:$0xff] }
  0x29   : > { %2479 = vmatpush3.bf16.msra.mxu0 %v2717_v5 }
  0x2a   : > { %2480 = vmatprep.subr.bf16.mxu0 %v2718_v6 }
  0x2d   : > { %2481 = vmatpush3.bf16.msra.mxu0 %v2719_v7 }
  0x2e   : > { %2482 = vmatprep.subr.bf16.mxu0 %v2720_v8 }
  0x31   : > { %2483 = vmatpush3.bf16.msra.mxu0 %v2721_v9 }
  0x32   : > { %2484 = vmatprep.subr.bf16.mxu0 %v2722_v10 }
  0x35   : > { %2485 = vmatpush3.bf16.msra.mxu0 %v2723_v14 }
  0x36   : > { %2486 = vmatprep.subr.bf16.mxu0 %v2724_v15 }
  0x39   : > { %2487 = vmatpush3.bf16.msra.mxu0 %v2725_v16 }
  0x3a   : > { %2488 = vmatprep.subr.bf16.mxu0 %v2726_v17 }
  0x3d   : > { %2489 = vmatpush3.bf16.msra.mxu0 %v2727_v18 }
  0x40   : > { %908 = vmatmul.mubr.bf16.vlgmr.msra.gmra.mrb[0].mxu0 %v743_v21 }
 0x113   : > { %v2490_v22 = vpop.f32.mrb[0].mxu0 }
 0x114   : > { %v2491_v24 = vpop.f32.mrb[1].mxu0 }
 0x115   : > { %v2492_v25 = vadd.f32 %v2491_v24, %v2490_v22  ;;  %v2493_v26 = vpop.f32.mrb[2].mxu0 }
 0x116   : > { %v2494_v28 = vpop.f32.mrb[3].mxu0 }
 0x117   : > { %v910_v29 = vadd.f32 %v2492_v25, %v777_v23  ;;  %v2495_v30 = vadd.f32 %v2494_v28, %v2493_v26 }
 0x119   : > { %917 = vst.msk [vmem:[#allocation2] sm:$0xff] %vm916_vm0, %v910_v29  ;;  %v913_v31 = vadd.f32 %v2495_v30, %v778_v27 }
 0x11b   : > { %918 = vst.msk [vmem:[#allocation2 + $0x8] sm:$0xff] %vm916_vm0, %v913_v31 }
 0x11c PF: > { %vm923_vm1 = vcmask 261120   ;;  %v2783_v46 = vld [vmem:[%s3020_s30] sm:$0xff]   ;;  %v2883_v47 = vmov 0.0   ;;  %v2784_v48 = vld [vmem:[%s3020_s30 + $0x8] sm:$0xff]   ;;  %vm2884_vm2 = vmmov 0   ;;  %s3419_s18 = scalar_lea.vmem %s3383_s4, %s3002_s29  ;;  %s3420_s20 = scalar_lea.vmem %s3384_s5, %s3002_s29  ;;  %vm1055_vm3 = vcmask 64512  }
 0x11d   : > { %2546 = vmatprep.subr.bf16.mxu1 %v2883_v47  ;;  %2550 = vmatprep.mubr.msk.bf16.mxu1 %vm2884_vm2, %v2883_v47  ;;  %v2414_v57 = vld [vmem:[%s3419_s18] ss:$0 sm:$0xff]  ;;  %s3421_s27 = scalar_lea.vmem %s3386_s7, %s3002_s29  ;;  %s2885_s0 = smov 120   ;;  %vm3169_vm4 = vmpackc.low %vm1055_vm3, %vm1055_vm3  ;;  %vm1400_vm5 = vcmask 130048   ;;  %vm1865_vm6 = vcmask 195584  }
 0x11e   : > { %2547 = vmatpush3.bf16.msra.mxu1 %v2783_v46  ;;  %v2415_v61 = vld [vmem:[%s3420_s20] ss:$0 sm:$0xff]  ;;  %s2886_s30 = smov 104   ;;  %s2887_s17 = smov 112  }
 0x11f   : > { %2548 = vmatprep.subr.bf16.mxu1 %v2883_v47  ;;  %v2416_v2 = vld [vmem:[%s3421_s27] ss:$0 sm:$0xff]  ;;  %s2888_s18 = smov 96   ;;  %s2889_s22 = smov 64  }
 0x120   : > { %v3125_v32 = vld [vmem:[#allocation2] sm:$0xff]  ;;  %s3424_s27 = sld [smem:[#allocation7_spill]]  ;;  %s3425_s21 = scalar_lea.vmem %s3388_s9, %s3002_s29 }
 0x121   : > { %v924_v34 = vsel %vm923_vm1, %v3125_v32, 0.0  ;;  %p2463_p5 = scmp.ne.s32.totalorder %s2996_s28, 1 }
 0x122   : > { %v3127_v33 = vld [vmem:[#allocation2 + $0x8] sm:$0xff]  ;;  %925 = vadd.xlane.f32.xlu0 %v924_v34  ;;  %2549 = vmatpush3.bf16.msra.mxu1 %v2784_v48 }
 0x123   : > { %v927_v35 = vsel %vm923_vm1, %v3127_v33, 0.0 }
 0x126   : > { %928 = vadd.xlane.f32.xlu0 %v927_v35 }
 0x1af   : > { %v926_v36 = vpop.xlane.xlu0 %925 }
 0x1b0   : > { %v931_v37 = vmul.f32 0.03125, %v926_v36 }
 0x1b2   : > { %v933_v38 = vsub.f32 %v3125_v32, %v931_v37 }
 0x1b3   : > { %v929_v39 = vpop.xlane.xlu0 %928 }
 0x1b4   : > { %v932_v40 = vmul.f32 0.03125, %v929_v39  ;;  %v935_v41 = vmul.f32 %v933_v38, %v933_v38  ;;  %v1049_v39 = vld [vmem:[%s3382_s3] sm:$0xff] }
 0x1b6   : > { %v934_v42 = vsub.f32 %v3127_v33, %v932_v40  ;;  %v937_v43 = vsel %vm923_vm1, %v935_v41, 0.0 }
 0x1b7   : > { %938 = vadd.xlane.f32.xlu1 %v937_v43 }
 0x1b8   : > { %v936_v44 = vmul.f32 %v934_v42, %v934_v42 }
 0x1ba   : > { %v940_v45 = vsel %vm923_vm1, %v936_v44, 0.0 }
 0x1bb   : > { %941 = vadd.xlane.f32.xlu1 %v940_v45 }
 0x244   : > { %v939_v49 = vpop.xlane.xlu1 %938 }
 0x245   : > { %v943_v50 = vmul.f32 0.03125, %v939_v49 }
 0x247   : > { %v945_v51 = vadd.f32 1e-05, %v943_v50 }
 0x248   : > { %v942_v52 = vpop.xlane.xlu1 %941 }
 0x249   : > { %2797 = vrsqrt.f32 %v945_v51  ;;  %v944_v53 = vmul.f32 0.03125, %v942_v52 }
 0x24b   : > { %v946_v54 = vadd.f32 1e-05, %v944_v53 }
 0x24d   : > { %2799 = vrsqrt.f32 %v946_v54 }
 0x253   : > { %v2798_v55 = vpop.eup %2797 }
 0x254   : > { %v949_v56 = vmul.f32 %v2798_v55, %v933_v38  ;;  %v1050_v38 = vld [vmem:[%s3382_s3 + $0x8] sm:$0xff] }
 0x256   : > { %v957_v60 = vmul.f32 %v2414_v57, %v949_v56 }
 0x257   : > { %v2800_v58 = vpop.eup %2799 }
 0x258   : > { %v950_v59 = vmul.f32 %v2800_v58, %v934_v42  ;;  %v965_v63 = vadd.f32 %v2415_v61, %v957_v60 }
 0x25a   : > { %v958_v62 = vmul.f32 %v2414_v57, %v950_v59 }
 0x25c   : > { %v966_v0 = vadd.f32 %v2415_v61, %v958_v62 }
 0x25e   : > { %v967_v1 = vpack.c.bf16 %v966_v0, %v965_v63 }
 0x260   : > { %2551 = vmatmul.mubr.msk.bf16.vlgmr.msra.gmra.mrb[0].mxu1 %vm923_vm1, %v967_v1 }
 0x333   : > { %v1028_v3 = vpop.f32.mrb[0].mxu1 }
 0x334   : > { %v1029_v4 = vadd.f32 %v2416_v2, %v1028_v3  ;;  %v2552_v5 = vpop.f32.mrb[1].mxu1 }
 0x335   : > { %v1031_v6 = vpop.f32.mrb[2].mxu1 }
 0x336   : > { %v1032_v7 = vadd.f32 %v2416_v2, %v1031_v6  ;;  %1037 = vrot.lane.b32.xlu0 %v1029_v4, %s2885_s0  ;;  %v2553_v8 = vpop.f32.mrb[3].mxu1  ;;  %2558 = vmatprep.mubr.msk.f32.mxu1 %vm1055_vm3, %v1029_v4 }
 0x338   : > { %1039 = vrot.lane.b32.xlu1 %v1032_v7, %s2885_s0  ;;  %v3160_v9 = vpack.i.bf16 %v1032_v7, %v1029_v4  ;;  %s2890_s0 = smov 16  }
 0x33a   : > { %1045 = vrot.lane.b32.xlu0 %v1029_v4, %s2886_s30 }
 0x33c   : > { %1041 = vrot.lane.b32.xlu1 %v1029_v4, %s2887_s17 }
 0x33e   : > { %2729 = vrot.lane.b32.xlu0 %v3160_v9, %s2888_s18 }
 0x340   : > { %1043 = vrot.lane.b32.xlu1 %v1032_v7, %s2887_s17  ;;  %s2892_s17 = smov 24  }
 0x344   : > { %1047 = vrot.lane.b32.xlu1 %v1032_v7, %s2886_s30  ;;  %s2891_s30 = smov 8  }
 0x3a8   : > { %v1038_v10 = vpop.permute.xlu0 %1037 }
 0x3aa   : > { %v1040_v11 = vpop.permute.xlu1 %1039 }
 0x3ab   : > { %v3163_v12 = vpack.i.bf16 %v1040_v11, %v1038_v10 }
 0x3ac   : > { %v1046_v13 = vpop.permute.xlu0 %1045 }
 0x3ad   : > { %2579 = vmatprep.mubr.msk.f32.mxu0 %vm1055_vm3, %v1046_v13  ;;  %2734 = vrot.lane.b32.xlu1 %v3163_v12, %s2888_s18 }
 0x3ae   : > { %v1042_v14 = vpop.permute.xlu1 %1041 }
 0x3b0   : > { %v2730_v15 = vpop.permute.xlu0 %2729 }
 0x3b1   : > { %v2732_v16 = vunpack.i.h.bf16 %v2730_v15  ;;  %v2731_v17 = vunpack.i.l.bf16 %v2730_v15 }
 0x3b2   : > { %v1044_v18 = vpop.permute.xlu1 %1043 }
 0x3b3   : > { %v2646_v20 = vpack.c.bf16 %v2732_v16, %v2731_v17  ;;  %v3173_v21 = vpack.i.bf16 %v1044_v18, %v1042_v14 }
 0x3b5   : > { %2648 = vmatprep.subr.msk.bf16.mxu1 %vm3169_vm4, %v2646_v20  ;;  %2739 = vrot.lane.b32.xlu0 %v3173_v21, %s2888_s18 }
 0x3b6   : > { %2651 = vmatpush3.bf16.xpose.msk.msra.mxu1 %vm3169_vm4, %v2646_v20  ;;  %v1048_v22 = vpop.permute.xlu1 %1047 }
 0x3b7   : > { %v3180_v23 = vpack.i.bf16 %v1048_v22, %v1046_v13 }
 0x3b9   : > { %2744 = vrot.lane.b32.xlu1 %v3180_v23, %s2888_s18 }
 0x3bd   : > { %2559 = vmatmul.mubr.msk.f32.vlgmr.msra.gmra.mrb[4].mxu1 %vm1055_vm3, %v1032_v7 }
 0x3be   : > { %2565 = vmatprep.mubr.msk.f32.mxu1 %vm1055_vm3, %v1038_v10 }
 0x41f   : > { %v2735_v24 = vpop.permute.xlu1 %2734 }
 0x420   : > { %v2737_v25 = vunpack.i.h.bf16 %v2735_v24  ;;  %v2736_v26 = vunpack.i.l.bf16 %v2735_v24 }
 0x422   : > { %v2652_v27 = vpack.c.bf16 %v2737_v25, %v2736_v26 }
 0x424   : > { %2654 = vmatprep.subr.msk.bf16.mxu1 %vm3169_vm4, %v2652_v27 }
 0x425   : > { %2657 = vmatpush3.bf16.xpose.msk.msra.mxu1 %vm3169_vm4, %v2652_v27 }
 0x427   : > { %v2740_v28 = vpop.permute.xlu0 %2739 }
 0x428   : > { %v2742_v29 = vunpack.i.h.bf16 %v2740_v28  ;;  %v2741_v30 = vunpack.i.l.bf16 %v2740_v28 }
 0x42a   : > { %v2658_v31 = vpack.c.bf16 %v2742_v29, %v2741_v30 }
 0x42b   : > { %v2745_v34 = vpop.permute.xlu1 %2744 }
 0x42c   : > { %v2747_v35 = vunpack.i.h.bf16 %v2745_v34  ;;  %v2746_v36 = vunpack.i.l.bf16 %v2745_v34  ;;  %2566 = vmatmul.mubr.msk.f32.vlgmr.msra.gmra.mrb[6].mxu1 %vm1055_vm3, %v1040_v11  ;;  %2660 = vmatprep.subr.msk.bf16.mxu1 %vm3169_vm4, %v2658_v31 }
 0x42d   : > { %2663 = vmatpush3.bf16.xpose.msk.msra.mxu1 %vm3169_vm4, %v2658_v31  ;;  %2572 = vmatprep.mubr.msk.f32.mxu1 %vm1055_vm3, %v1042_v14 }
 0x42e   : > { %v2664_v37 = vpack.c.bf16 %v2747_v35, %v2746_v36 }
 0x430   : > { %2666 = vmatprep.subr.msk.bf16.mxu0 %vm3169_vm4, %v2664_v37 }
 0x431   : > { %2669 = vmatpush3.bf16.xpose.msk.msra.mxu0 %vm3169_vm4, %v2664_v37 }
 0x434   : > { %2573 = vmatmul.mubr.msk.f32.vlgmr.msra.gmra.mrb[8].mxu1 %vm1055_vm3, %v1044_v18 }
 0x438   : > { %2580 = vmatmul.mubr.msk.f32.vlgmr.msra.gmra.mrb[0].mxu0 %vm1055_vm3, %v1048_v22 }
 0x490   : > { %v2560_v40 = vpop.f32.mrb[4].mxu1 }
 0x491   : > { %v1136_v41 = vadd.f32 %v2560_v40, %v1050_v38  ;;  %v1130_v42 = vpop.f32.mrb[5].mxu1 }
 0x492   : > { %v1131_v43 = vadd.f32 %v1130_v42, %v1049_v39 }
 0x493   : > { %v1404_v44 = vsel %vm1400_vm5, %v1136_v41, -inf }
 0x494   : > { %1405 = vmax.xlane.f32.xlu1 %v1404_v44  ;;  %v1401_v45 = vsel %vm1400_vm5, %v1131_v43, -inf }
 0x495   : > { %1402 = vmax.xlane.f32.xlu0 %v1401_v45 }
 0x4ff   : > { %v2567_v46 = vpop.f32.mrb[6].mxu1 }
 0x500   : > { %v1223_v48 = vadd.f32 %v2567_v46, %v1050_v38  ;;  %v1217_v49 = vpop.f32.mrb[7].mxu1 }
 0x501   : > { %v1218_v50 = vadd.f32 %v1217_v49, %v1049_v39 }
 0x502   : > { %v1410_v51 = vsel %vm1400_vm5, %v1223_v48, -inf }
 0x503   : > { %1411 = vmax.xlane.f32.xlu0 %v1410_v51  ;;  %v1407_v52 = vsel %vm1400_vm5, %v1218_v50, -inf }
 0x507   : > { %v2574_v53 = vpop.f32.mrb[8].mxu1  ;;  %1408 = vmax.xlane.f32.xlu0 %v1407_v52 }
 0x508   : > { %v1310_v54 = vadd.f32 %v2574_v53, %v1050_v38  ;;  %v1304_v55 = vpop.f32.mrb[9].mxu1 }
 0x509   : > { %v1305_v56 = vadd.f32 %v1304_v55, %v1049_v39 }
 0x50a   : > { %v1416_v57 = vsel %vm1400_vm5, %v1310_v54, -inf }
 0x50b   : > { %v2581_v58 = vpop.f32.mrb[0].mxu0  ;;  %1417 = vmax.xlane.f32.xlu1 %v1416_v57  ;;  %v1413_v59 = vsel %vm1400_vm5, %v1305_v56, -inf }
 0x50c   : > { %v1397_v60 = vadd.f32 %v2581_v58, %v1050_v38  ;;  %v1391_v61 = vpop.f32.mrb[1].mxu0  ;;  %1414 = vmax.xlane.f32.xlu0 %v1413_v59 }
 0x50d   : > { %v1392_v62 = vadd.f32 %v1391_v61, %v1049_v39 }
 0x50e   : > { %v1422_v63 = vsel %vm1400_vm5, %v1397_v60, -inf }
 0x50f   : > { %1423 = vmax.xlane.f32.xlu1 %v1422_v63  ;;  %v1419_v0 = vsel %vm1400_vm5, %v1392_v62, -inf }
 0x510   : > { %1420 = vmax.xlane.f32.xlu0 %v1419_v0 }
 0x521   : > { %v1406_v1 = vpop.xlane.xlu1 %1405 }
 0x522   : > { %v1426_v2 = vsub.f32 %v1136_v41, %v1406_v1  ;;  %v1403_v3 = vpop.xlane.xlu0 %1402 }
 0x523   : > { %v1425_v4 = vsub.f32 %v1131_v43, %v1403_v3 }
 0x524   : > { %v1435_v5 = vmul.f32 1.442695, %v1426_v2 }
 0x525   : > { %v1433_v6 = vmul.f32 1.442695, %v1425_v4 }
 0x526   : > { %2801 = vpow2.f32 %v1435_v5 }
 0x527   : > { %2803 = vpow2.f32 %v1433_v6 }
 0x530   : > { %v3215_v7 = vpop.eup %2801 }
 0x531   : > { %v2804_v8 = vpop.eup %2803  ;;  %v1452_v10 = vsel %vm1400_vm5, %v3215_v7, 0.0 }
 0x532   : > { %1453 = vadd.xlane.f32.xlu1 %v1452_v10  ;;  %v1449_v11 = vsel %vm1400_vm5, %v2804_v8, 0.0 }
 0x533   : > { %1450 = vadd.xlane.f32.xlu0 %v1449_v11 }
 0x590   : > { %v1412_v13 = vpop.xlane.xlu0 %1411 }
 0x591   : > { %v1428_v14 = vsub.f32 %v1223_v48, %v1412_v13 }
 0x593   : > { %v1439_v15 = vmul.f32 1.442695, %v1428_v14 }
 0x594   : > { %v1409_v16 = vpop.xlane.xlu0 %1408 }
 0x595   : > { %2805 = vpow2.f32 %v1439_v15  ;;  %v1427_v17 = vsub.f32 %v1218_v50, %v1409_v16 }
 0x597   : > { %v1437_v18 = vmul.f32 1.442695, %v1427_v17 }
 0x598   : > { %v1418_v19 = vpop.xlane.xlu1 %1417 }
 0x599   : > { %2807 = vpow2.f32 %v1437_v18  ;;  %v1415_v20 = vpop.xlane.xlu0 %1414  ;;  %v1430_v22 = vsub.f32 %v1310_v54, %v1418_v19 }
 0x59a   : > { %v1429_v24 = vsub.f32 %v1305_v56, %v1415_v20 }
 0x59b   : > { %v1443_v30 = vmul.f32 1.442695, %v1430_v22 }
 0x59c   : > { %v1424_v25 = vpop.xlane.xlu1 %1423  ;;  %v1441_v34 = vmul.f32 1.442695, %v1429_v24  ;;  %v2785_v24 = vld [vmem:[%s3424_s27] sm:$0xff]  }
 0x59d   : > { %v1432_v26 = vsub.f32 %v1397_v60, %v1424_v25  ;;  %v1421_v27 = vpop.xlane.xlu0 %1420 }
 0x59e   : > { %v1431_v28 = vsub.f32 %v1392_v62, %v1421_v27 }
 0x59f   : > { %v3220_v29 = vpop.eup %2805  ;;  %v1447_v31 = vmul.f32 1.442695, %v1432_v26  ;;  %v2786_v26 = vld [vmem:[%s3424_s27 + $0x8] sm:$0xff]   ;;  %s3426_s27 = scalar_lea.vmem %s3394_s15, %s3002_s29 }
 0x5a0   : > { %v1445_v35 = vmul.f32 1.442695, %v1431_v28  ;;  %v1458_v36 = vsel %vm1400_vm5, %v3220_v29, 0.0 }
 0x5a1   : > { %2809 = vpow2.f32 %v1447_v31  ;;  %1459 = vadd.xlane.f32.xlu1 %v1458_v36 }
 0x5a2   : > { %2811 = vpow2.f32 %v1445_v35 }
 0x5a3   : > { %v3224_v37 = vpop.eup %2807  ;;  %2813 = vpow2.f32 %v1443_v30 }
 0x5a4   : > { %2815 = vpow2.f32 %v1441_v34  ;;  %v1455_v38 = vsel %vm1400_vm5, %v3224_v37, 0.0 }
 0x5a5   : > { %1456 = vadd.xlane.f32.xlu0 %v1455_v38 }
 0x5ab   : > { %v3228_v39 = vpop.eup %2809 }
 0x5ac   : > { %v3230_v40 = vpop.eup %2811  ;;  %v1470_v41 = vsel %vm1400_vm5, %v3228_v39, 0.0 }
 0x5ad   : > { %v3234_v42 = vpop.eup %2813  ;;  %1471 = vadd.xlane.f32.xlu1 %v1470_v41  ;;  %v1467_v43 = vsel %vm1400_vm5, %v3230_v40, 0.0 }
 0x5ae   : > { %v2816_v44 = vpop.eup %2815  ;;  %1468 = vadd.xlane.f32.xlu0 %v1467_v43  ;;  %v1464_v45 = vsel %vm1400_vm5, %v3234_v42, 0.0 }
 0x5af   : > { %v1461_v46 = vsel %vm1400_vm5, %v2816_v44, 0.0 }
 0x5b1   : > { %1465 = vadd.xlane.f32.xlu1 %v1464_v45 }
 0x5b2   : > { %1462 = vadd.xlane.f32.xlu0 %v1461_v46 }
 0x5bf   : > { %v1454_v51 = vpop.xlane.xlu1 %1453 }
 0x5c0   : > { %v1451_v48 = vpop.xlane.xlu0 %1450 }
 0x5c1   : > { %2817 = vrcp.f32 %v1451_v48 }
 0x5c2   : > { %2754 = vrot.lane.b32.xlu1 %v3163_v12, %s2889_s22  ;;  %2819 = vrcp.f32 %v1454_v51 }
 0x5c6   : > { %2759 = vrot.lane.b32.xlu1 %v3173_v21, %s2889_s22 }
 0x5c8   : > { %2749 = vrot.lane.b32.xlu0 %v3160_v9, %s2889_s22 }
 0x5ca   : > { %2764 = vrot.lane.b32.xlu1 %v3180_v23, %s2889_s22 }
 0x5cb   : > { %v2818_v49 = vpop.eup %2817 }
 0x5cc   : > { %v1474_v50 = vmul.f32 %v2818_v49, %v2804_v8  ;;  %v2820_v62 = vpop.eup %2819 }
 0x5cd   : > { %v1476_v6 = vmul.f32 %v2820_v62, %v3215_v7 }
 0x5ce   : > { %2586 = vmatprep.mubr.msk.f32.mxu1 %vm1400_vm5, %v1474_v50 }
 0x62e   : > { %v1460_v52 = vpop.xlane.xlu1 %1459 }
 0x632   : > { %v1457_v53 = vpop.xlane.xlu0 %1456 }
 0x633   : > { %2821 = vrcp.f32 %v1457_v53 }
 0x63a   : > { %v1472_v54 = vpop.xlane.xlu1 %1471 }
 0x63b   : > { %v1469_v55 = vpop.xlane.xlu0 %1468 }
 0x63d   : > { %v2822_v1 = vpop.eup %2821 }
 0x63e   : > { %v1466_v56 = vpop.xlane.xlu1 %1465  ;;  %v1478_v14 = vmul.f32 %v2822_v1, %v3224_v37 }
 0x63f   : > { %2823 = vrcp.f32 %v1466_v56  ;;  %v1463_v12 = vpop.xlane.xlu0 %1462  ;;  %v2444_v56 = vld [vmem:[%s3425_s21] ss:$0 sm:$0xff]  ;;  %s3428_s21 = sld [smem:[#allocation14_spill]] (!%p2463_p5) }
 0x640   : > { %2825 = vrcp.f32 %v1463_v12 }
 0x641   : > { %2827 = vrcp.f32 %v1460_v52 }
 0x642   : > { %2829 = vrcp.f32 %v1469_v55  ;;  %v2755_v9 = vpop.permute.xlu1 %2754 }
 0x643   : > { %v2750_v21 = vpop.permute.xlu0 %2749  ;;  %v2757_v23 = vunpack.i.h.bf16 %v2755_v9  ;;  %v2756_v57 = vunpack.i.l.bf16 %v2755_v9  ;;  %2831 = vrcp.f32 %v1472_v54 }
 0x644   : > { %v2752_v58 = vunpack.i.h.bf16 %v2750_v21  ;;  %v2751_v59 = vunpack.i.l.bf16 %v2750_v21 }
 0x645   : > { %v2674_v2 = vpack.c.bf16 %v2757_v23, %v2756_v57 }
 0x646   : > { %v2670_v60 = vpack.c.bf16 %v2752_v58, %v2751_v59  ;;  %v2760_v61 = vpop.permute.xlu1 %2759 }
 0x647   : > { %v2762_v63 = vunpack.i.h.bf16 %v2760_v61  ;;  %v2761_v0 = vunpack.i.l.bf16 %v2760_v61 }
 0x648   : > { %2671 = vmatprep.subr.bf16.mxu1 %v2670_v60 }
 0x649   : > { %v2824_v3 = vpop.eup %2823  ;;  %v2678_v4 = vpack.c.bf16 %v2762_v63, %v2761_v0  ;;  %2673 = vmatpush3.bf16.msra.mxu1 %v2670_v60 }
 0x64a   : > { %v2826_v5 = vpop.eup %2825  ;;  %v2765_v8 = vpop.permute.xlu1 %2764  ;;  %2675 = vmatprep.subr.bf16.mxu1 %v2674_v2  ;;  %v1484_v17 = vmul.f32 %v2824_v3, %v3234_v42 }
 0x64b   : > { %v2828_v10 = vpop.eup %2827  ;;  %v2767_v11 = vunpack.i.h.bf16 %v2765_v8  ;;  %v2766_v13 = vunpack.i.l.bf16 %v2765_v8  ;;  %2679 = vmatprep.subr.bf16.mxu0 %v2678_v4  ;;  %v1482_v15 = vmul.f32 %v2826_v5, %v2816_v44  ;;  %v2787_v8 = vld [vmem:[%s3042_s6] sm:$0xff]  }
 0x64c   : > { %v2830_v16 = vpop.eup %2829  ;;  %2587 = vmatmul.mubr.msk.f32.vlgmr.msra.gmra.mrb[10].mxu1 %vm1400_vm5, %v1476_v6  ;;  %2681 = vmatpush3.bf16.msra.mxu0 %v2678_v4  ;;  %v1480_v7 = vmul.f32 %v2828_v10, %v3220_v29  ;;  %v2788_v10 = vld [vmem:[%s3042_s6 + $0x8] sm:$0xff]  }
 0x64d   : > { %v2682_v18 = vpack.c.bf16 %v2767_v11, %v2766_v13  ;;  %2677 = vmatpush3.bf16.msra.mxu1 %v2674_v2  ;;  %2593 = vmatprep.mubr.msk.f32.mxu1 %vm1400_vm5, %v1478_v14  ;;  %v2832_v19 = vpop.eup %2831  ;;  %v1486_v20 = vmul.f32 %v2830_v16, %v3230_v40  ;;  %v2789_v11 = vld [vmem:[%s3052_s1] sm:$0xff]   ;;  %v2790_v13 = vld [vmem:[%s3052_s1 + $0x8] sm:$0xff]  }
 0x64e   : > { %2600 = vmatprep.mubr.msk.f32.mxu0 %vm1400_vm5, %v1482_v15  ;;  %2610 = vmatprep.subr.bf16.mxu0 %v2883_v47  ;;  %v1488_v22 = vmul.f32 %v2832_v19, %v3228_v39 }
 0x64f   : > { %2601 = vmatmul.mubr.msk.f32.vlgmr.msra.gmra.mrb[2].mxu0 %vm1400_vm5, %v1484_v17  ;;  %2683 = vmatprep.subr.bf16.mxu1 %v2682_v18 }
 0x650   : > { %2594 = vmatmul.mubr.msk.f32.vlgmr.msra.gmra.mrb[12].mxu1 %vm1400_vm5, %v1480_v7  ;;  %2614 = vmatprep.mubr.msk.bf16.mxu0 %vm2884_vm2, %v2883_v47 }
 0x651   : > { %2685 = vmatpush3.bf16.msra.mxu1 %v2682_v18  ;;  %2607 = vmatprep.mubr.msk.f32.mxu1 %vm1400_vm5, %v1486_v20 }
 0x652   : > { %2618 = vmatprep.subr.bf16.mxu1 %v2883_v47  ;;  %2611 = vmatpush3.bf16.msra.mxu0 %v2785_v24 }
 0x653   : > { %2612 = vmatprep.subr.bf16.mxu0 %v2883_v47 }
 0x654   : > { %2608 = vmatmul.mubr.msk.f32.vlgmr.msra.gmra.mrb[14].mxu1 %vm1400_vm5, %v1488_v22  ;;  %v2448_v22 = vld [vmem:[%s714_s16] ss:$0 sm:$0xff] }
 0x655   : > { %2622 = vmatprep.mubr.msk.bf16.mxu1 %vm2884_vm2, %v2883_v47  ;;  %2619 = vmatpush3.bf16.msra.mxu1 %v2787_v8 }
 0x656   : > { %2613 = vmatpush3.bf16.msra.mxu0 %v2786_v26  ;;  %2620 = vmatprep.subr.bf16.mxu1 %v2883_v47 }
 0x657   : > { %2626 = vmatprep.subr.bf16.mxu0 %v2883_v47 }
 0x659   : > { %2621 = vmatpush3.bf16.msra.mxu1 %v2788_v10 }
 0x71f   : > { %v2588_v25 = vpop.f32.mrb[10].mxu1 }
 0x720   : > { %v1567_v27 = vpop.f32.mrb[11].mxu1 }
 0x722   : > { %v2602_v28 = vpop.f32.mrb[2].mxu0 }
 0x723   : > { %v2595_v29 = vpop.f32.mrb[12].mxu1  ;;  %v1741_v30 = vpop.f32.mrb[3].mxu0 }
 0x724   : > { %v2773_v31 = vpack.i.bf16 %v2602_v28, %v1741_v30  ;;  %v1654_v34 = vpop.f32.mrb[13].mxu1 }
 0x725   : > { %v2768_v35 = vpack.i.bf16 %v2595_v29, %v1654_v34  ;;  %v2791_v34 = vld [vmem:[%s3052_s1 + $0x10] sm:$0xff]  }
 0x726   : > { %2774 = vrot.lane.b32.xlu1 %v2773_v31, %s2890_s0 }
 0x727   : > { %2769 = vrot.lane.b32.xlu0 %v2768_v35, %s2891_s30  ;;  %v2609_v36 = vpop.f32.mrb[14].mxu1  ;;  %v2792_v35 = vld [vmem:[%s3052_s1 + $0x18] sm:$0xff]  }
 0x728   : > { %v1828_v37 = vpop.f32.mrb[15].mxu1 }
 0x729   : > { %v2778_v38 = vpack.i.bf16 %v2609_v36, %v1828_v37  ;;  %v2793_v36 = vld [vmem:[%s3052_s1 + $0x20] sm:$0xff]   ;;  %v2794_v37 = vld [vmem:[%s3052_s1 + $0x28] sm:$0xff]  }
 0x72b   : > { %2779 = vrot.lane.b32.xlu0 %v2778_v38, %s2892_s17  ;;  %v2795_v38 = vld [vmem:[%s3052_s1 + $0x30] sm:$0xff]   ;;  %s3427_s17 = sld [smem:[#allocation13_spill]] (!%p2463_p5) }
 0x798   : > { %v2775_v40 = vpop.permute.xlu1 %2774 }
 0x799   : > { %v2770_v39 = vpop.permute.xlu0 %2769  ;;  %v2777_v45 = vunpack.i.h.bf16 %v2775_v40  ;;  %v2776_v46 = vunpack.i.l.bf16 %v2775_v40  ;;  %v2450_v40 = vld [vmem:[%s725_s8] ss:$0 sm:$0xff] }
 0x79a   : > { %v2772_v41 = vunpack.i.h.bf16 %v2770_v39  ;;  %v2771_v42 = vunpack.i.l.bf16 %v2770_v39  ;;  %v2796_v39 = vld [vmem:[%s3052_s1 + $0x38] sm:$0xff]  }
 0x79c   : > { %v1862_v43 = vsel %vm1055_vm3, %v2588_v25, %v2772_v41  ;;  %v1861_v44 = vsel %vm1055_vm3, %v1567_v27, %v2771_v42  ;;  %v2449_v27 = vld [vmem:[%s717_s24] ss:$0 sm:$0xff] }
 0x79d   : > { %v2780_v48 = vpop.permute.xlu0 %2779  ;;  %v1863_v51 = vsel %vm1400_vm5, %v1861_v44, %v2776_v46  ;;  %v1864_v52 = vsel %vm1400_vm5, %v1862_v43, %v2777_v45 }
 0x79e   : > { %v2782_v49 = vunpack.i.h.bf16 %v2780_v48  ;;  %v2781_v50 = vunpack.i.l.bf16 %v2780_v48 }
 0x7a0   : > { %v1867_v53 = vsel %vm1865_vm6, %v1864_v52, %v2782_v49  ;;  %v1866_v54 = vsel %vm1865_vm6, %v1863_v51, %v2781_v50 }
 0x7a1   : > { %v1868_v55 = vpack.c.bf16 %v1867_v53, %v1866_v54 }
 0x7a3   : > { %2615 = vmatmul.mubr.msk.bf16.vlgmr.msra.gmra.mrb[4].mxu0 %vm923_vm1, %v1868_v55 }
 0x7a4   : > { %2642 = vmatprep.mubr.msk.bf16.mxu0 %vm2884_vm2, %v2883_v47  ;;  %2627 = vmatpush3.bf16.msra.mxu0 %v2789_v11 }
 0x7a5   : > { %2628 = vmatprep.subr.bf16.mxu0 %v2883_v47 }
 0x7a8   : > { %2629 = vmatpush3.bf16.msra.mxu0 %v2790_v13 }
 0x7a9   : > { %2630 = vmatprep.subr.bf16.mxu0 %v2883_v47 }
 0x7ac   : > { %2631 = vmatpush3.bf16.msra.mxu0 %v2791_v34 }
 0x7ad   : > { %2632 = vmatprep.subr.bf16.mxu0 %v2883_v47 }
 0x7b0   : > { %2633 = vmatpush3.bf16.msra.mxu0 %v2792_v35 }
 0x7b1   : > { %2634 = vmatprep.subr.bf16.mxu0 %v2883_v47 }
 0x7b4   : > { %2635 = vmatpush3.bf16.msra.mxu0 %v2793_v36 }
 0x7b5   : > { %2636 = vmatprep.subr.bf16.mxu0 %v2883_v47 }
 0x7b8   : > { %2637 = vmatpush3.bf16.msra.mxu0 %v2794_v37 }
 0x7b9   : > { %2638 = vmatprep.subr.bf16.mxu0 %v2883_v47 }
 0x7bc   : > { %2639 = vmatpush3.bf16.msra.mxu0 %v2795_v38 }
 0x7bd   : > { %2640 = vmatprep.subr.bf16.mxu0 %v2883_v47 }
 0x7c0   : > { %2641 = vmatpush3.bf16.msra.mxu0 %v2796_v39 }
 0x876   : > { %v1929_v12 = vpop.f32.mrb[4].mxu0 }
 0x877   : > { %v1930_v9 = vadd.f32 %v2444_v56, %v1929_v12  ;;  %v2616_v21 = vpop.f32.mrb[5].mxu0 }
 0x878   : > { %v1932_v23 = vpop.f32.mrb[6].mxu0 }
 0x879   : > { %v3283_v57 = vadd.f32 %v1930_v9, %v3125_v32  ;;  %v1933_v58 = vadd.f32 %v2444_v56, %v1932_v23  ;;  %v2617_v59 = vpop.f32.mrb[7].mxu0  ;;  %v2454_v9 = vld [vmem:[%s3426_s27] ss:$0 sm:$0xff] }
 0x87b   : > { %v3286_v60 = vadd.f32 %v1933_v58, %v3127_v33  ;;  %v1940_v61 = vsel %vm923_vm1, %v3283_v57, 0.0 }
 0x87c   : > { %1941 = vadd.xlane.f32.xlu1 %v1940_v61 }
 0x87d   : > { %v1943_v62 = vsel %vm923_vm1, %v3286_v60, 0.0 }
 0x87e   : > { %1944 = vadd.xlane.f32.xlu0 %v1943_v62 }
 0x909   : > { %v1942_v63 = vpop.xlane.xlu1 %1941 }
 0x90a   : > { %v1946_v0 = vmul.f32 0.03125, %v1942_v63 }
 0x90b   : > { %v1945_v32 = vpop.xlane.xlu0 %1944 }
 0x90c   : > { %v1948_v1 = vsub.f32 %v3283_v57, %v1946_v0  ;;  %v1947_v2 = vmul.f32 0.03125, %v1945_v32 }
 0x90e   : > { %v1949_v33 = vsub.f32 %v3286_v60, %v1947_v2  ;;  %v1950_v3 = vmul.f32 %v1948_v1, %v1948_v1 }
 0x910   : > { %v1952_v4 = vsel %vm923_vm1, %v1950_v3, 0.0  ;;  %v1951_v5 = vmul.f32 %v1949_v33, %v1949_v33 }
 0x911   : > { %1953 = vadd.xlane.f32.xlu0 %v1952_v4 }
 0x912   : > { %v1955_v6 = vsel %vm923_vm1, %v1951_v5, 0.0 }
 0x915   : > { %1956 = vadd.xlane.f32.xlu0 %v1955_v6 }
 0x99e   : > { %v1954_v14 = vpop.xlane.xlu0 %1953 }
 0x99f   : > { %v1958_v15 = vmul.f32 0.03125, %v1954_v14 }
 0x9a1   : > { %v1960_v16 = vadd.f32 1e-05, %v1958_v15 }
 0x9a2   : > { %v1957_v17 = vpop.xlane.xlu0 %1956 }
 0x9a3   : > { %2833 = vrsqrt.f32 %v1960_v16  ;;  %v1959_v18 = vmul.f32 0.03125, %v1957_v17 }
 0x9a5   : > { %v1961_v7 = vadd.f32 1e-05, %v1959_v18 }
 0x9a7   : > { %2835 = vrsqrt.f32 %v1961_v7  ;;  %v2464_v7 = vld [vmem:[%s3427_s17] ss:$0 sm:$0xff] (!%p2463_p5) }
 0x9ad   : > { %v2834_v19 = vpop.eup %2833 }
 0x9ae   : > { %v1964_v20 = vmul.f32 %v2834_v19, %v1948_v1 }
 0x9b0   : > { %v1972_v25 = vmul.f32 %v2448_v22, %v1964_v20  ;;  %v2465_v20 = vld [vmem:[%s3428_s21] ss:$0 sm:$0xff] (!%p2463_p5) }
 0x9b1   : > { %v2836_v24 = vpop.eup %2835 }
 0x9b2   : > { %v1965_v26 = vmul.f32 %v2836_v24, %v1949_v33  ;;  %v1980_v29 = vadd.f32 %v2449_v27, %v1972_v25 }
 0x9b4   : > { %v1973_v28 = vmul.f32 %v2448_v22, %v1965_v26 }
 0x9b6   : > { %v1981_v30 = vadd.f32 %v2449_v27, %v1973_v28 }
 0x9b8   : > { %v1982_v31 = vpack.c.bf16 %v1981_v30, %v1980_v29 }
 0x9ba   : > { %2623 = vmatmul.mubr.msk.bf16.vlgmr.msra.gmra.mrb[16].mxu1 %vm923_vm1, %v1982_v31 }
 0xa8d   : > { %v2043_v41 = vpop.f32.mrb[16].mxu1 }
 0xa8e   : > { %v2044_v42 = vadd.f32 %v2450_v40, %v2043_v41  ;;  %v2624_v43 = vpop.f32.mrb[17].mxu1 }
 0xa8f   : > { %v2046_v44 = vpop.f32.mrb[18].mxu1 }
 0xa90   : > { %v2052_v45 = vmul.f32 0.70710677, %v2044_v42  ;;  %v2047_v46 = vadd.f32 %v2450_v40, %v2046_v44  ;;  %v2625_v48 = vpop.f32.mrb[19].mxu1  ;;  %v2050_v52 = vmul.f32 0.5, %v2044_v42 }
 0xa92   : > { %2837 = verf.f32 %v2052_v45  ;;  %v2053_v49 = vmul.f32 0.70710677, %v2047_v46  ;;  %v2051_v53 = vmul.f32 0.5, %v2047_v46 }
 0xa94   : > { %2839 = verf.f32 %v2053_v49 }
 0xa9c   : > { %v2838_v50 = vpop.eup %2837 }
 0xa9d   : > { %v2056_v47 = vadd.f32 1.0, %v2838_v50 }
 0xa9e   : > { %v2840_v51 = vpop.eup %2839 }
 0xa9f   : > { %v2057_v54 = vadd.f32 1.0, %v2840_v51  ;;  %v2058_v55 = vmul.f32 %v2056_v47, %v2050_v52 }
 0xaa1   : > { %v2059_v56 = vmul.f32 %v2057_v54, %v2051_v53 }
 0xaa3   : > { %v2060_v12 = vpack.c.bf16 %v2059_v56, %v2058_v55 }
 0xaa5   : > { %2643 = vmatmul.mubr.bf16.vlgmr.msra.gmra.mrb[8].mxu0 %v2060_v12 }
 0xb78   : > { %v2166_v21 = vpop.f32.mrb[8].mxu0 }
 0xb79   : > { %v2167_v23 = vadd.f32 %v2454_v9, %v2166_v21  ;;  %v2644_v58 = vpop.f32.mrb[9].mxu0  ;;  %2180 = sbr.rel (%p2463_p5) target bundleno = 3260 (0xcbc), region = 100 }
 0xb7a   : > { %v2169_v59 = vpop.f32.mrb[10].mxu0 }
 0xb7b   : > { %v2173_v61 = vadd.f32 %v2167_v23, %v3283_v57  ;;  %v2170_v62 = vadd.f32 %v2454_v9, %v2169_v59  ;;  %v2645_v63 = vpop.f32.mrb[11].mxu0 }
 0xb7d   : > { %2175 = vst.msk [vmem:[#allocation2] sm:$0xff] %vm923_vm1, %v2173_v61  ;;  %v2174_v0 = vadd.f32 %v2170_v62, %v3286_v60  ;;  %v2183_v32 = vsel (!%p2463_p5), %vm923_vm1, %v2173_v61, 0.0 }
 0xb7e   : > { %2184 = vadd.xlane.f32.xlu0 (!%p2463_p5), %v2183_v32 }
 0xb7f   : > { %2176 = vst.msk [vmem:[#allocation2 + $0x8] sm:$0xff] %vm923_vm1, %v2174_v0  ;;  %v2186_v1 = vsel (!%p2463_p5), %vm923_vm1, %v2174_v0, 0.0 }
 0xb82   : > { %2187 = vadd.xlane.f32.xlu0 %v2186_v1 }
 0xc0b   : > { %v2185_v2 = vpop.xlane.xlu0 %2184 }
 0xc0c   : > { %v2189_v33 = vmul.f32 0.03125, %v2185_v2 }
 0xc0e   : > { %v2191_v57 = vsub.f32 %v2173_v61, %v2189_v33 }
 0xc0f   : > { %v2188_v3 = vpop.xlane.xlu0 %2187 }
 0xc10   : > { %v2190_v4 = vmul.f32 0.03125, %v2188_v3  ;;  %v2193_v5 = vmul.f32 %v2191_v57, %v2191_v57 }
 0xc12   : > { %v2192_v6 = vsub.f32 %v2174_v0, %v2190_v4  ;;  %v2195_v60 = vsel %vm923_vm1, %v2193_v5, 0.0 }
 0xc13   : > { %2196 = vadd.xlane.f32.xlu1 %v2195_v60 }
 0xc14   : > { %v2194_v8 = vmul.f32 %v2192_v6, %v2192_v6 }
 0xc16   : > { %v2198_v10 = vsel %vm923_vm1, %v2194_v8, 0.0 }
 0xc17   : > { %2199 = vadd.xlane.f32.xlu1 %v2198_v10 }
 0xca0   : > { %v2197_v11 = vpop.xlane.xlu1 %2196 }
 0xca1   : > { %v2201_v13 = vmul.f32 0.03125, %v2197_v11 }
 0xca3   : > { %v2203_v14 = vadd.f32 1e-05, %v2201_v13 }
 0xca4   : > { %v2200_v15 = vpop.xlane.xlu1 %2199 }
 0xca5   : > { %2841 = vrsqrt.f32 %v2203_v14  ;;  %v2202_v16 = vmul.f32 0.03125, %v2200_v15 }
 0xca7   : > { %v2204_v17 = vadd.f32 1e-05, %v2202_v16 }
 0xca9   : > { %2843 = vrsqrt.f32 %v2204_v17 }
 0xcaf   : > { %v2842_v18 = vpop.eup %2841 }
 0xcb0   : > { %v2207_v19 = vmul.f32 %v2842_v18, %v2191_v57 }
 0xcb2   : > { %v2215_v22 = vmul.f32 %v2464_v7, %v2207_v19 }
 0xcb3   : > { %v2844_v24 = vpop.eup %2843 }
 0xcb4   : > { %v2223_v25 = vadd.f32 %v2465_v20, %v2215_v22  ;;  %v2208_v26 = vmul.f32 %v2844_v24, %v2192_v6 }
 0xcb6   : > { %v2225_v27 = vsel %vm923_vm1, %v2223_v25, 0.0  ;;  %v2216_v28 = vmul.f32 %v2464_v7, %v2208_v26 }
 0xcb7   : > { %2227 = vst [vmem:[#allocation3] sm:$0xff] %v2225_v27 }
 0xcb8   : > { %v2224_v29 = vadd.f32 %v2465_v20, %v2216_v28 }
 0xcba   : > { %v2226_v30 = vsel %vm923_vm1, %v2224_v29, 0.0 }
 0xcbb   : > { %2228 = vst [vmem:[#allocation3 + $0x8] sm:$0xff] %v2226_v30 }
 0xcbc PF: > { %p2690_p6 = scmp.eq.s32.totalorder %s2996_s28, 1  ;;  %s2893_s6 = smov [#allocation3]  }
 0xcbd   : > { %s2235_s20 = sshll.u32 %s2893_s6, 4  ;;  %s2236_s20 = int_to_ptr.vmem [resolvable:$true] %s2235_s20 }
 0xcbe   : > { %s2845_s23 = scalar_lea.vmem %s2236_s20, 256  ;;  %p2852_p10 = scmp.lt.s32.totalorder %s2236_s20, %s2236_s20 }
 0xcbf   : > { %p2846_p7 = scmp.ne.s32.totalorder %s2236_s20, %s2845_s23  ;;  %p2853_p11 = scmp.lt.s32.totalorder %s2845_s23, %s2845_s23 }
 0xcc1   : > { %p2847_p8 = pnand %p2846_p7, %p2690_p6  ;;  %p2854_p12 = por %p2853_p11, %p2852_p10 }
 0xcc3   : > { %p2848_p9 = pneg %p2847_p8 }
 0xcc5   : > { %p2855_p13 = pnand %p2854_p12, %p2848_p9 }
 0xcc7   : > { %2858 = shalt.err (!%p2855_p13)
}
 0xcc8   : > { %s3429_s24 = sld [smem:[#allocation15_spill]] }
 0xcce   : > { %s2859_s8 = scalar_lea.hbm %s3429_s24, 256 }
 0xccf   : > { %p2860_p0 = scmp.ne.s32.totalorder %s3429_s24, %s2859_s8  ;;  %p2865_p3 = scmp.lt.u32.totalorder %s2859_s8, %s3429_s24 }
 0xcd1   : > { %p2861_p1 = pnand %p2860_p0, %p2690_p6 }
 0xcd3   : > { %p2862_p2 = pneg %p2861_p1 }
 0xcd5   : > { %p2867_p4 = pnand %p2865_p3, %p2862_p2 }
 0xcd7   : > { %2870 = shalt.err (!%p2867_p4)
}
 0xcd8   : > { %s2894_s17 = smov 128  }
 0xcd9   : > { %2687 = dma.vmem_to_hbm [thread:$0]  (%p2690_p6), %s2236_s20, 256, %s3429_s24, [#allocation4], %s2894_s17, %s2894_s17, %s2891_s30  }
 0xcda   : > { %2876 = dma.done.wait (%p2690_p6), [#allocation4], 256  }
 0xcdb   : > { %2878 = vsyncadd (%p2690_p6), [#allocation4], 4294967040 }
 0xcdc PF: > { %s3430_s21 = sld [smem:[#allocation6_spill]] }
 0xce2   : > { %s29_s27 = sadd.s32 1, %s3430_s21  }
 0xce3   : > { %p26_p5 = scmp.ge.s32.totalorder %s29_s27, 4  }
 0xce5   :  { %28 = sbr.rel (!%p26_p5) target bundleno = 10 (0xa), region = 160 }
 0xcec   :  { %2251 = vsyncpa [#allocation4], 1 }
 0xced   :  { %2253 = vsyncpa [#allocation4 + $0x1], 1 }

</bundles_post_ra>
